<compile_context>
chip_gen: v6e
topology: v6e:2x2x1
jax: 0.10.0
libtpu: 0.0.40
codegen_flags: <defaults>
</compile_context>

<pallas_src>
import functools

import jax
import jax.numpy as jnp
import numpy as np
from jax.experimental import pallas as pl
from jax.experimental.pallas import tpu as pltpu


# ---------------------------------------------------------------------------
# Stage 1 (row-wise, grid (B, T/TT)):
#   out1 = x + 0.5 * FF1(x);  q,k,v = proj(LN2(out1))   (head-major layout)
# ---------------------------------------------------------------------------
def _stage1_kernel(num_heads,
                   x_ref, vec_ref, ff1_b1_ref, ff1_w1_ref, ff1_w2_ref,
                   wqkv_ref, bqkv_ref,
                   out1_ref, q_ref, k_ref, v_ref):
    x = x_ref[0]                                   # (TT, D)
    vec = vec_ref[...]                             # (5, D)
    ln1_w, ln1_b, ff1_b2, ln2_w, ln2_b = (vec[i] for i in range(5))

    def ln(v, w, b, eps=1e-5):
        mu = jnp.mean(v, axis=-1, keepdims=True)
        var = jnp.mean(jnp.square(v - mu), axis=-1, keepdims=True)
        return (v - mu) * jax.lax.rsqrt(var + eps) * w + b

    # Macaron half-step feed-forward
    h = ln(x, ln1_w, ln1_b)
    h = jnp.dot(h, ff1_w1_ref[...], preferred_element_type=jnp.float32) + ff1_b1_ref[0]
    h = h * jax.nn.sigmoid(h)                      # Swish
    h = jnp.dot(h, ff1_w2_ref[...], preferred_element_type=jnp.float32) + ff1_b2
    out1 = x + 0.5 * h
    out1_ref[0] = out1

    # pre-LN + per-head QKV projections (head slicing on leading weight axis only)
    h2 = ln(out1, ln2_w, ln2_b)
    bqkv = bqkv_ref[...]                           # (3, H, dh)
    for hh in range(num_heads):
        q_ref[0, hh] = jnp.dot(h2, wqkv_ref[0, hh],
                               preferred_element_type=jnp.float32) + bqkv[0, hh]
        k_ref[0, hh] = jnp.dot(h2, wqkv_ref[1, hh],
                               preferred_element_type=jnp.float32) + bqkv[1, hh]
        v_ref[0, hh] = jnp.dot(h2, wqkv_ref[2, hh],
                               preferred_element_type=jnp.float32) + bqkv[2, hh]


# ---------------------------------------------------------------------------
# Stage 2 (query-tiled attention, grid (B, T/TT)):
#   out2 = out1 + MHSA;  attn written per (H, TT, T) tile
# ---------------------------------------------------------------------------
def _stage2_kernel(num_heads, head_dim,
                   out1_ref, q_ref, k_ref, v_ref, wo_ref, bo_ref,
                   out2_ref, attn_ref):
    out1 = out1_ref[0]                             # (TT, D)
    scale = 1.0 / (float(head_dim) ** 0.5)
    acc = jnp.zeros(out1.shape, jnp.float32)
    for hh in range(num_heads):
        qh = q_ref[0, hh]                          # (TT, dh)
        kh = k_ref[0, hh]                          # (T,  dh)
        vh = v_ref[0, hh]                          # (T,  dh)
        s = jax.lax.dot_general(qh, kh, (((1,), (1,)), ((), ())),
                                preferred_element_type=jnp.float32) * scale
        s = s - jnp.max(s, axis=-1, keepdims=True)
        e = jnp.exp(s)
        a = e * pl.reciprocal(jnp.sum(e, axis=-1, keepdims=True), approx=True)
        attn_ref[0, hh] = a
        ctx = jnp.dot(a, vh, preferred_element_type=jnp.float32)          # (TT, dh)
        # accumulate the output projection per head -> no lane concat
        acc = acc + jnp.dot(ctx, wo_ref[hh], preferred_element_type=jnp.float32)
    out2_ref[0] = out1 + acc + bo_ref[0]


# ---------------------------------------------------------------------------
# Stage 3 (per batch element, grid (B,) -- depthwise conv needs the time halo):
#   out = LN( out2 + Conv(out2) + 0.5 * FF2(out2 + Conv(out2)) )
# ---------------------------------------------------------------------------
def _stage3_kernel(kernel_size,
                   y_ref, vec_ref, ff2_b1_ref,
                   pw1a_w_ref, pw1b_w_ref, dw_w_ref, pw2_w_ref,
                   ff2_w1_ref, ff2_w2_ref,
                   o_ref):
    y = y_ref[0]                                   # (T, D)
    T, D = y.shape
    vec = vec_ref[...]                             # (13, D)
    (ln3_w, ln3_b, pw1a_b, pw1b_b, dw_b, bn_scale, bn_shift, pw2_b,
     ln4_w, ln4_b, ff2_b2, lnf_w, lnf_b) = (vec[i] for i in range(13))

    def ln(v, w, b, eps=1e-5):
        mu = jnp.mean(v, axis=-1, keepdims=True)
        var = jnp.mean(jnp.square(v - mu), axis=-1, keepdims=True)
        return (v - mu) * jax.lax.rsqrt(var + eps) * w + b

    def swish(v):
        return v * jax.nn.sigmoid(v)

    # ---- Conformer conv module ----
    h = ln(y, ln3_w, ln3_b)
    a = jnp.dot(h, pw1a_w_ref[...], preferred_element_type=jnp.float32) + pw1a_b
    g = jnp.dot(h, pw1b_w_ref[...], preferred_element_type=jnp.float32) + pw1b_b
    h = a * jax.nn.sigmoid(g)                      # GLU (pw1 split host-side)

    # depthwise conv ("same" padding) via XLU rolls + edge masks
    pad = (kernel_size - 1) // 2
    dw = dw_w_ref[...]                             # (K, D)
    row = jax.lax.broadcasted_iota(jnp.int32, (T, D), 0)
    acc = jnp.zeros((T, D), jnp.float32)
    for kk in range(kernel_size):
        off = kk - pad
        shifted = h if off == 0 else pltpu.roll(h, shift=(-off) % T, axis=0)
        valid = jnp.logical_and(row + off >= 0, row + off < T)
        acc = acc + jnp.where(valid, shifted, 0.0) * dw[kk]
    h = acc + dw_b
    h = h * bn_scale + bn_shift                    # eval-mode BatchNorm folded to affine
    h = swish(h)
    h = jnp.dot(h, pw2_w_ref[...], preferred_element_type=jnp.float32) + pw2_b
    y = y + h

    # ---- FF_2 (half-step residual) ----
    hf = ln(y, ln4_w, ln4_b)
    hf = jnp.dot(hf, ff2_w1_ref[...], preferred_element_type=jnp.float32) + ff2_b1_ref[0]
    hf = swish(hf)
    hf = jnp.dot(hf, ff2_w2_ref[...], preferred_element_type=jnp.float32) + ff2_b2
    y = y + 0.5 * hf

    # ---- final LayerNorm ----
    o_ref[0] = ln(y, lnf_w, lnf_b)


# ---------------------------------------------------------------------------
# Wrapper
# ---------------------------------------------------------------------------
def _replicated(shape):
    nd = len(shape)
    return pl.BlockSpec(shape, lambda *_idx, _nd=nd: (0,) * _nd)


def _pick_time_tile(T, target):
    if T <= target:
        return T
    for cand in range(target, 7, -8):
        if cand % 8 == 0 and T % cand == 0:
            return cand
    return T  # fall back to the full (always legal) extent


def conformer_block(x, params, num_heads, kernel_size, time_tile=256):
    B, T, D = x.shape
    A = params["wq"].shape[1]
    dh = A // num_heads
    f32 = jnp.float32

    # ---- host-side parameter re-packing (tiny, once per call) ----
    wqkv = jnp.stack([params[n].reshape(D, num_heads, dh).transpose(1, 0, 2)
                      for n in ("wq", "wk", "wv")])                    # (3, H, D, dh)
    bqkv = jnp.stack([params[n].reshape(num_heads, dh)
                      for n in ("bq", "bk", "bv")])                    # (3, H, dh)
    wo_h = params["wo"].reshape(num_heads, dh, D)                      # (H, dh, D)

    pw1a_w = params["pw1_w"][:, :D]                                    # GLU value half
    pw1b_w = params["pw1_w"][:, D:]                                    # GLU gate half
    pw1a_b = params["pw1_b"][0, :D]
    pw1b_b = params["pw1_b"][0, D:]
    bn_scale = params["bn_g"][0] * jax.lax.rsqrt(params["bn_v"][0] + 1e-5)
    bn_shift = params["bn_bt"][0] - params["bn_m"][0] * bn_scale

    vec1 = jnp.stack([params["ln1_w"][0], params["ln1_b"][0], params["ff1_b2"][0],
                      params["ln2_w"][0], params["ln2_b"][0]])         # (5, D)
    vec3 = jnp.stack([params["ln3_w"][0], params["ln3_b"][0], pw1a_b, pw1b_b,
                      params["dw_b"][0], bn_scale, bn_shift, params["pw2_b"][0],
                      params["ln4_w"][0], params["ln4_b"][0], params["ff2_b2"][0],
                      params["lnf_w"][0], params["lnf_b"][0]])         # (13, D)

    TT = _pick_time_tile(T, time_tile)
    nT = T // TT

    # ---------------- stage 1 ----------------
    out1, q, k, v = pl.pallas_call(
        functools.partial(_stage1_kernel, num_heads),
        grid=(B, nT),
        in_specs=[
            pl.BlockSpec((1, TT, D), lambda b, r: (b, r, 0)),
            _replicated(vec1.shape), _replicated(params["ff1_b1"].shape),
            _replicated(params["ff1_w1"].shape), _replicated(params["ff1_w2"].shape),
            _replicated(wqkv.shape), _replicated(bqkv.shape),
        ],
        out_specs=(
            pl.BlockSpec((1, TT, D), lambda b, r: (b, r, 0)),
            pl.BlockSpec((1, num_heads, TT, dh), lambda b, r: (b, 0, r, 0)),
            pl.BlockSpec((1, num_heads, TT, dh), lambda b, r: (b, 0, r, 0)),
            pl.BlockSpec((1, num_heads, TT, dh), lambda b, r: (b, 0, r, 0)),
        ),
        out_shape=(
            jax.ShapeDtypeStruct((B, T, D), f32),
            jax.ShapeDtypeStruct((B, num_heads, T, dh), f32),
            jax.ShapeDtypeStruct((B, num_heads, T, dh), f32),
            jax.ShapeDtypeStruct((B, num_heads, T, dh), f32),
        ),
        compiler_params=pltpu.CompilerParams(
            dimension_semantics=("parallel", "parallel")),
    )(x, vec1, params["ff1_b1"], params["ff1_w1"], params["ff1_w2"], wqkv, bqkv)

    # ---------------- stage 2 ----------------
    out2, attn = pl.pallas_call(
        functools.partial(_stage2_kernel, num_heads, dh),
        grid=(B, nT),
        in_specs=[
            pl.BlockSpec((1, TT, D), lambda b, qi: (b, qi, 0)),
            pl.BlockSpec((1, num_heads, TT, dh), lambda b, qi: (b, 0, qi, 0)),
            pl.BlockSpec((1, num_heads, T, dh), lambda b, qi: (b, 0, 0, 0)),
            pl.BlockSpec((1, num_heads, T, dh), lambda b, qi: (b, 0, 0, 0)),
            _replicated(wo_h.shape), _replicated(params["bo"].shape),
        ],
        out_specs=(
            pl.BlockSpec((1, TT, D), lambda b, qi: (b, qi, 0)),
            pl.BlockSpec((1, num_heads, TT, T), lambda b, qi: (b, 0, qi, 0)),
        ),
        out_shape=(
            jax.ShapeDtypeStruct((B, T, D), f32),
            jax.ShapeDtypeStruct((B, num_heads, T, T), f32),
        ),
        compiler_params=pltpu.CompilerParams(
            dimension_semantics=("parallel", "parallel")),
    )(out1, q, k, v, wo_h, params["bo"])

    # ---------------- stage 3 ----------------
    out = pl.pallas_call(
        functools.partial(_stage3_kernel, kernel_size),
        grid=(B,),
        in_specs=[
            pl.BlockSpec((1, T, D), lambda b: (b, 0, 0)),
            _replicated(vec3.shape), _replicated(params["ff2_b1"].shape),
            _replicated(pw1a_w.shape), _replicated(pw1b_w.shape),
            _replicated(params["dw_w"].shape), _replicated(params["pw2_w"].shape),
            _replicated(params["ff2_w1"].shape), _replicated(params["ff2_w2"].shape),
        ],
        out_specs=pl.BlockSpec((1, T, D), lambda b: (b, 0, 0)),
        out_shape=jax.ShapeDtypeStruct((B, T, D), f32),
        compiler_params=pltpu.CompilerParams(dimension_semantics=("parallel",)),
    )(out2, vec3, params["ff2_b1"], pw1a_w, pw1b_w,
      params["dw_w"], params["pw2_w"], params["ff2_w1"], params["ff2_w2"])

    return out, attn


# ---------------------------------------------------------------------------
# Pure-JAX reference and parameter construction (unchanged semantics)
# ---------------------------------------------------------------------------
def reference(x, p, num_heads, kernel_size):
    def ln(v, w, b, eps=1e-5):
        mu = v.mean(-1, keepdims=True)
        var = ((v - mu) ** 2).mean(-1, keepdims=True)
        return (v - mu) * jax.lax.rsqrt(var + eps) * w[0] + b[0]

    def ff(v, w1, b1, w2, b2, lw, lb):
        h = ln(v, lw, lb)
        h = h @ w1 + b1[0]
        h = h * jax.nn.sigmoid(h)
        return h @ w2 + b2[0]

    B, T, D = x.shape
    A = p["wq"].shape[1]
    dh = A // num_heads

    out = x + 0.5 * ff(x, p["ff1_w1"], p["ff1_b1"], p["ff1_w2"], p["ff1_b2"], p["ln1_w"], p["ln1_b"])

    h = ln(out, p["ln2_w"], p["ln2_b"])
    q = (h @ p["wq"] + p["bq"][0]).reshape(B, T, num_heads, dh).transpose(0, 2, 1, 3)
    k = (h @ p["wk"] + p["bk"][0]).reshape(B, T, num_heads, dh).transpose(0, 2, 1, 3)
    v = (h @ p["wv"] + p["bv"][0]).reshape(B, T, num_heads, dh).transpose(0, 2, 1, 3)
    s = jnp.einsum("bhqd,bhkd->bhqk", q, k) / (float(dh) ** 0.5)
    attn = jax.nn.softmax(s, axis=-1)
    ctx = jnp.einsum("bhqk,bhkd->bhqd", attn, v).transpose(0, 2, 1, 3).reshape(B, T, A)
    out = out + (ctx @ p["wo"] + p["bo"][0])

    h = ln(out, p["ln3_w"], p["ln3_b"])
    h = h @ p["pw1_w"] + p["pw1_b"][0]
    h = h[..., :D] * jax.nn.sigmoid(h[..., D:])
    pad = (kernel_size - 1) // 2
    hp = jnp.pad(h, ((0, 0), (pad, pad), (0, 0)))
    acc = jnp.zeros_like(h)
    for kk in range(kernel_size):
        acc = acc + hp[:, kk:kk + T, :] * p["dw_w"][kk]
    h = acc + p["dw_b"][0]
    h = (h - p["bn_m"][0]) * jax.lax.rsqrt(p["bn_v"][0] + 1e-5) * p["bn_g"][0] + p["bn_bt"][0]
    h = h * jax.nn.sigmoid(h)
    h = h @ p["pw2_w"] + p["pw2_b"][0]
    out = out + h

    out = out + 0.5 * ff(out, p["ff2_w1"], p["ff2_b1"], p["ff2_w2"], p["ff2_b2"], p["ln4_w"], p["ln4_b"])
    out = ln(out, p["lnf_w"], p["lnf_b"])
    return out, attn


def make_params(key, D, A, ffe, ce, K):
    keys = iter(jax.random.split(key, 64))

    def nrm(shape, scale=0.02):
        return (scale * jax.random.normal(next(keys), shape)).astype(jnp.float32)

    return dict(
        ln1_w=1.0 + nrm((1, D), 0.1), ln1_b=nrm((1, D)),
        ff1_w1=nrm((D, D * ffe)), ff1_b1=nrm((1, D * ffe)),
        ff1_w2=nrm((D * ffe, D)), ff1_b2=nrm((1, D)),
        ln2_w=1.0 + nrm((1, D), 0.1), ln2_b=nrm((1, D)),
        wq=nrm((D, A)), bq=nrm((1, A)),
        wk=nrm((D, A)), bk=nrm((1, A)),
        wv=nrm((D, A)), bv=nrm((1, A)),
        wo=nrm((A, D)), bo=nrm((1, D)),
        ln3_w=1.0 + nrm((1, D), 0.1), ln3_b=nrm((1, D)),
        pw1_w=nrm((D, ce * D)), pw1_b=nrm((1, ce * D)),
        dw_w=nrm((K, D), 0.1), dw_b=nrm((1, D)),
        bn_g=1.0 + nrm((1, D), 0.1), bn_bt=nrm((1, D)),
        bn_m=nrm((1, D)), bn_v=1.0 + jnp.abs(nrm((1, D), 0.1)),
        pw2_w=nrm((D, D)), pw2_b=nrm((1, D)),
        ln4_w=1.0 + nrm((1, D), 0.1), ln4_b=nrm((1, D)),
        ff2_w1=nrm((D, D * ffe)), ff2_b1=nrm((1, D * ffe)),
        ff2_w2=nrm((D * ffe, D)), ff2_b2=nrm((1, D)),
        lnf_w=1.0 + nrm((1, D), 0.1), lnf_b=nrm((1, D)),
    )


if __name__ == "__main__":
    # Small shapes: batch=2, time=16, encoder_dim=32, attention_dim=32, heads=4,
    # ff_expansion=4, conv_expansion=2, conv_kernel_size=7.
    B, T, D = 2, 16, 32
    A, H = 32, 4
    FFE, CE, K = 4, 2, 7

    key = jax.random.PRNGKey(0)
    kx, kp = jax.random.split(key)
    x = jax.random.normal(kx, (B, T, D), dtype=jnp.float32)
    params = make_params(kp, D, A, FFE, CE, K)

    out, attn = conformer_block(x, params, num_heads=H, kernel_size=K)
    out = jax.block_until_ready(out)
    attn = jax.block_until_ready(attn)

    ref_out, ref_attn = reference(x, params, num_heads=H, kernel_size=K)
    np.testing.assert_allclose(np.asarray(out), np.asarray(ref_out), rtol=5e-2, atol=5e-2)
    np.testing.assert_allclose(np.asarray(attn), np.asarray(ref_attn), rtol=5e-2, atol=5e-2)
    assert out.shape == (B, T, D) and attn.shape == (B, H, T, T)

    print("KERNEL_OK")
</pallas_src>

<mosaic_0001>
module attributes {stable_mosaic.version = 11 : i64} {
  func.func @_stage1_kernel(%arg0: i32, %arg1: i32, %arg2: memref<1x16x32xf32, #tpu.memory_space<vmem>>, %arg3: memref<5x32xf32, #tpu.memory_space<vmem>>, %arg4: memref<1x128xf32, #tpu.memory_space<vmem>>, %arg5: memref<32x128xf32, #tpu.memory_space<vmem>>, %arg6: memref<128x32xf32, #tpu.memory_space<vmem>>, %arg7: memref<3x4x32x8xf32, #tpu.memory_space<vmem>>, %arg8: memref<3x4x8xf32, #tpu.memory_space<vmem>>, %arg9: memref<1x16x32xf32, #tpu.memory_space<vmem>>, %arg10: memref<1x4x16x8xf32, #tpu.memory_space<vmem>>, %arg11: memref<1x4x16x8xf32, #tpu.memory_space<vmem>>, %arg12: memref<1x4x16x8xf32, #tpu.memory_space<vmem>>) attributes {dimension_semantics = [#tpu.dimension_semantics<parallel>, #tpu.dimension_semantics<parallel>], iteration_bounds = array<i64: 2, 1>, scalar_prefetch = 0 : i64, scratch_operands = 0 : i64, tpu.core_type = #tpu.core_type<tc>, window_params = [{transform_indices = @transform_0, window_bounds = array<i64: 1, 16, 32>}, {pipeline_mode = #tpu.pipeline_mode<synchronous>, transform_indices = @transform_1, window_bounds = array<i64: 5, 32>}, {pipeline_mode = #tpu.pipeline_mode<synchronous>, transform_indices = @transform_2, window_bounds = array<i64: 1, 128>}, {pipeline_mode = #tpu.pipeline_mode<synchronous>, transform_indices = @transform_3, window_bounds = array<i64: 32, 128>}, {pipeline_mode = #tpu.pipeline_mode<synchronous>, transform_indices = @transform_4, window_bounds = array<i64: 128, 32>}, {pipeline_mode = #tpu.pipeline_mode<synchronous>, transform_indices = @transform_5, window_bounds = array<i64: 3, 4, 32, 8>}, {pipeline_mode = #tpu.pipeline_mode<synchronous>, transform_indices = @transform_6, window_bounds = array<i64: 3, 4, 8>}, {transform_indices = @transform_7, window_bounds = array<i64: 1, 16, 32>}, {transform_indices = @transform_8, window_bounds = array<i64: 1, 4, 16, 8>}, {transform_indices = @transform_9, window_bounds = array<i64: 1, 4, 16, 8>}, {transform_indices = @transform_10, window_bounds = array<i64: 1, 4, 16, 8>}]} {
    %c0 = arith.constant 0 : index
    %c0_0 = arith.constant 0 : index
    %c0_1 = arith.constant 0 : index
    %0 = vector.load %arg2[%c0, %c0_0, %c0_1] : memref<1x16x32xf32, #tpu.memory_space<vmem>>, vector<1x16x32xf32>
    %1 = vector.shape_cast %0 : vector<1x16x32xf32> to vector<16x32xf32>
    %c0_2 = arith.constant 0 : index
    %c0_3 = arith.constant 0 : index
    %2 = vector.load %arg3[%c0_2, %c0_3] : memref<5x32xf32, #tpu.memory_space<vmem>>, vector<5x32xf32>
    %3 = vector.extract_strided_slice %2 {offsets = [0, 0], sizes = [1, 32], strides = [1, 1]} : vector<5x32xf32> to vector<1x32xf32>
    %4 = vector.shape_cast %3 : vector<1x32xf32> to vector<32xf32>
    %5 = vector.extract_strided_slice %2 {offsets = [1, 0], sizes = [1, 32], strides = [1, 1]} : vector<5x32xf32> to vector<1x32xf32>
    %6 = vector.shape_cast %5 : vector<1x32xf32> to vector<32xf32>
    %7 = vector.extract_strided_slice %2 {offsets = [2, 0], sizes = [1, 32], strides = [1, 1]} : vector<5x32xf32> to vector<1x32xf32>
    %8 = vector.shape_cast %7 : vector<1x32xf32> to vector<32xf32>
    %9 = vector.extract_strided_slice %2 {offsets = [3, 0], sizes = [1, 32], strides = [1, 1]} : vector<5x32xf32> to vector<1x32xf32>
    %10 = vector.shape_cast %9 : vector<1x32xf32> to vector<32xf32>
    %11 = vector.extract_strided_slice %2 {offsets = [4, 0], sizes = [1, 32], strides = [1, 1]} : vector<5x32xf32> to vector<1x32xf32>
    %12 = vector.shape_cast %11 : vector<1x32xf32> to vector<32xf32>
    %cst = arith.constant dense<0.000000e+00> : vector<16xf32>
    %13 = vector.multi_reduction <add>, %1, %cst [1] : vector<16x32xf32> to vector<16xf32>
    %14 = vector.shape_cast %13 : vector<16xf32> to vector<16x1xf32>
    %cst_4 = arith.constant 3.200000e+01 : f32
    %15 = vector.broadcast %cst_4 : f32 to vector<16x1xf32>
    %16 = arith.divf %14, %15 : vector<16x1xf32>
    %17 = vector.broadcast %16 : vector<16x1xf32> to vector<16x32xf32>
    %18 = arith.subf %1, %17 : vector<16x32xf32>
    %19 = arith.mulf %18, %18 : vector<16x32xf32>
    %cst_5 = arith.constant dense<0.000000e+00> : vector<16xf32>
    %20 = vector.multi_reduction <add>, %19, %cst_5 [1] : vector<16x32xf32> to vector<16xf32>
    %21 = vector.shape_cast %20 : vector<16xf32> to vector<16x1xf32>
    %cst_6 = arith.constant 3.200000e+01 : f32
    %22 = vector.broadcast %cst_6 : f32 to vector<16x1xf32>
    %23 = arith.divf %21, %22 : vector<16x1xf32>
    %24 = vector.broadcast %16 : vector<16x1xf32> to vector<16x32xf32>
    %25 = arith.subf %1, %24 : vector<16x32xf32>
    %cst_7 = arith.constant 9.99999974E-6 : f32
    %26 = vector.broadcast %cst_7 : f32 to vector<16x1xf32>
    %27 = arith.addf %23, %26 : vector<16x1xf32>
    %28 = math.rsqrt %27 : vector<16x1xf32>
    %29 = vector.broadcast %28 : vector<16x1xf32> to vector<16x32xf32>
    %30 = arith.mulf %25, %29 : vector<16x32xf32>
    %31 = vector.shape_cast %4 : vector<32xf32> to vector<1x32xf32>
    %32 = vector.broadcast %31 : vector<1x32xf32> to vector<16x32xf32>
    %33 = arith.mulf %30, %32 : vector<16x32xf32>
    %34 = vector.shape_cast %6 : vector<32xf32> to vector<1x32xf32>
    %35 = vector.broadcast %34 : vector<1x32xf32> to vector<16x32xf32>
    %36 = arith.addf %33, %35 : vector<16x32xf32>
    %c0_8 = arith.constant 0 : index
    %c0_9 = arith.constant 0 : index
    %37 = vector.load %arg5[%c0_8, %c0_9] : memref<32x128xf32, #tpu.memory_space<vmem>>, vector<32x128xf32>
    %cst_10 = arith.constant dense<0.000000e+00> : vector<16x128xf32>
    %38 = tpu.matmul %36, %37, %cst_10 {dimension_numbers = #tpu.dot_dimension_numbers<[1], [0], [0], [1], [0, 0, 1, 1], [], []>} : vector<16x32xf32>, vector<32x128xf32>, vector<16x128xf32> -> vector<16x128xf32>
    %c0_11 = arith.constant 0 : index
    %c0_12 = arith.constant 0 : index
    %39 = vector.load %arg4[%c0_11, %c0_12] : memref<1x128xf32, #tpu.memory_space<vmem>>, vector<1x128xf32>
    %40 = vector.shape_cast %39 : vector<1x128xf32> to vector<128xf32>
    %41 = vector.shape_cast %40 : vector<128xf32> to vector<1x128xf32>
    %42 = vector.broadcast %41 : vector<1x128xf32> to vector<16x128xf32>
    %43 = arith.addf %38, %42 : vector<16x128xf32>
    %44 = arith.negf %43 : vector<16x128xf32>
    %45 = math.exp %44 : vector<16x128xf32>
    %cst_13 = arith.constant 1.000000e+00 : f32
    %46 = vector.broadcast %cst_13 : f32 to vector<16x128xf32>
    %47 = arith.addf %46, %45 : vector<16x128xf32>
    %48 = arith.divf %46, %47 : vector<16x128xf32>
    %49 = arith.mulf %43, %48 : vector<16x128xf32>
    %c0_14 = arith.constant 0 : index
    %c0_15 = arith.constant 0 : index
    %50 = vector.load %arg6[%c0_14, %c0_15] : memref<128x32xf32, #tpu.memory_space<vmem>>, vector<128x32xf32>
    %cst_16 = arith.constant dense<0.000000e+00> : vector<16x32xf32>
    %51 = tpu.matmul %49, %50, %cst_16 {dimension_numbers = #tpu.dot_dimension_numbers<[1], [0], [0], [1], [0, 0, 1, 1], [], []>} : vector<16x128xf32>, vector<128x32xf32>, vector<16x32xf32> -> vector<16x32xf32>
    %52 = vector.shape_cast %8 : vector<32xf32> to vector<1x32xf32>
    %53 = vector.broadcast %52 : vector<1x32xf32> to vector<16x32xf32>
    %54 = arith.addf %51, %53 : vector<16x32xf32>
    %cst_17 = arith.constant 5.000000e-01 : f32
    %55 = vector.broadcast %cst_17 : f32 to vector<16x32xf32>
    %56 = arith.mulf %55, %54 : vector<16x32xf32>
    %57 = arith.addf %1, %56 : vector<16x32xf32>
    %c0_18 = arith.constant 0 : index
    %c0_19 = arith.constant 0 : index
    %c0_20 = arith.constant 0 : index
    %58 = vector.load %arg9[%c0_18, %c0_19, %c0_20] : memref<1x16x32xf32, #tpu.memory_space<vmem>>, vector<1x16x32xf32>
    %59 = vector.shape_cast %58 : vector<1x16x32xf32> to vector<16x32xf32>
    %60 = vector.shape_cast %57 : vector<16x32xf32> to vector<1x16x32xf32>
    tpu.vector_store %arg9[%c0_18, %c0_19, %c0_20], %60 {strides = array<i32>} : memref<1x16x32xf32, #tpu.memory_space<vmem>>, vector<1x16x32xf32>,
    %cst_21 = arith.constant dense<0.000000e+00> : vector<16xf32>
    %61 = vector.multi_reduction <add>, %57, %cst_21 [1] : vector<16x32xf32> to vector<16xf32>
    %62 = vector.shape_cast %61 : vector<16xf32> to vector<16x1xf32>
    %cst_22 = arith.constant 3.200000e+01 : f32
    %63 = vector.broadcast %cst_22 : f32 to vector<16x1xf32>
    %64 = arith.divf %62, %63 : vector<16x1xf32>
    %65 = vector.broadcast %64 : vector<16x1xf32> to vector<16x32xf32>
    %66 = arith.subf %57, %65 : vector<16x32xf32>
    %67 = arith.mulf %66, %66 : vector<16x32xf32>
    %cst_23 = arith.constant dense<0.000000e+00> : vector<16xf32>
    %68 = vector.multi_reduction <add>, %67, %cst_23 [1] : vector<16x32xf32> to vector<16xf32>
    %69 = vector.shape_cast %68 : vector<16xf32> to vector<16x1xf32>
    %cst_24 = arith.constant 3.200000e+01 : f32
    %70 = vector.broadcast %cst_24 : f32 to vector<16x1xf32>
    %71 = arith.divf %69, %70 : vector<16x1xf32>
    %72 = vector.broadcast %64 : vector<16x1xf32> to vector<16x32xf32>
    %73 = arith.subf %57, %72 : vector<16x32xf32>
    %cst_25 = arith.constant 9.99999974E-6 : f32
    %74 = vector.broadcast %cst_25 : f32 to vector<16x1xf32>
    %75 = arith.addf %71, %74 : vector<16x1xf32>
    %76 = math.rsqrt %75 : vector<16x1xf32>
    %77 = vector.broadcast %76 : vector<16x1xf32> to vector<16x32xf32>
    %78 = arith.mulf %73, %77 : vector<16x32xf32>
    %79 = vector.shape_cast %10 : vector<32xf32> to vector<1x32xf32>
    %80 = vector.broadcast %79 : vector<1x32xf32> to vector<16x32xf32>
    %81 = arith.mulf %78, %80 : vector<16x32xf32>
    %82 = vector.shape_cast %12 : vector<32xf32> to vector<1x32xf32>
    %83 = vector.broadcast %82 : vector<1x32xf32> to vector<16x32xf32>
    %84 = arith.addf %81, %83 : vector<16x32xf32>
    %c0_26 = arith.constant 0 : index
    %c0_27 = arith.constant 0 : index
    %c0_28 = arith.constant 0 : index
    %85 = vector.load %arg8[%c0_26, %c0_27, %c0_28] : memref<3x4x8xf32, #tpu.memory_space<vmem>>, vector<3x4x8xf32>
    %c0_29 = arith.constant 0 : index
    %c0_30 = arith.constant 0 : index
    %c0_31 = arith.constant 0 : index
    %c0_32 = arith.constant 0 : index
    %86 = vector.load %arg7[%c0_29, %c0_30, %c0_31, %c0_32] : memref<3x4x32x8xf32, #tpu.memory_space<vmem>>, vector<1x1x32x8xf32>
    %87 = vector.shape_cast %86 : vector<1x1x32x8xf32> to vector<32x8xf32>
    %cst_33 = arith.constant dense<0.000000e+00> : vector<16x8xf32>
    %88 = tpu.matmul %84, %87, %cst_33 {dimension_numbers = #tpu.dot_dimension_numbers<[1], [0], [0], [1], [0, 0, 1, 1], [], []>} : vector<16x32xf32>, vector<32x8xf32>, vector<16x8xf32> -> vector<16x8xf32>
    %89 = vector.extract_strided_slice %85 {offsets = [0, 0, 0], sizes = [1, 1, 8], strides = [1, 1, 1]} : vector<3x4x8xf32> to vector<1x1x8xf32>
    %90 = vector.shape_cast %89 : vector<1x1x8xf32> to vector<8xf32>
    %91 = vector.shape_cast %90 : vector<8xf32> to vector<1x8xf32>
    %92 = vector.broadcast %91 : vector<1x8xf32> to vector<16x8xf32>
    %93 = arith.addf %88, %92 : vector<16x8xf32>
    %c0_34 = arith.constant 0 : index
    %c0_35 = arith.constant 0 : index
    %c0_36 = arith.constant 0 : index
    %c0_37 = arith.constant 0 : index
    %94 = vector.load %arg10[%c0_34, %c0_35, %c0_36, %c0_37] : memref<1x4x16x8xf32, #tpu.memory_space<vmem>>, vector<1x1x16x8xf32>
    %95 = vector.shape_cast %94 : vector<1x1x16x8xf32> to vector<16x8xf32>
    %96 = vector.shape_cast %93 : vector<16x8xf32> to vector<1x1x16x8xf32>
    tpu.vector_store %arg10[%c0_34, %c0_35, %c0_36, %c0_37], %96 {strides = array<i32>} : memref<1x4x16x8xf32, #tpu.memory_space<vmem>>, vector<1x1x16x8xf32>,
    %c1 = arith.constant 1 : index
    %c0_38 = arith.constant 0 : index
    %c0_39 = arith.constant 0 : index
    %c0_40 = arith.constant 0 : index
    %97 = vector.load %arg7[%c1, %c0_38, %c0_39, %c0_40] : memref<3x4x32x8xf32, #tpu.memory_space<vmem>>, vector<1x1x32x8xf32>
    %98 = vector.shape_cast %97 : vector<1x1x32x8xf32> to vector<32x8xf32>
    %cst_41 = arith.constant dense<0.000000e+00> : vector<16x8xf32>
    %99 = tpu.matmul %84, %98, %cst_41 {dimension_numbers = #tpu.dot_dimension_numbers<[1], [0], [0], [1], [0, 0, 1, 1], [], []>} : vector<16x32xf32>, vector<32x8xf32>, vector<16x8xf32> -> vector<16x8xf32>
    %100 = vector.extract_strided_slice %85 {offsets = [1, 0, 0], sizes = [1, 1, 8], strides = [1, 1, 1]} : vector<3x4x8xf32> to vector<1x1x8xf32>
    %101 = vector.shape_cast %100 : vector<1x1x8xf32> to vector<8xf32>
    %102 = vector.shape_cast %101 : vector<8xf32> to vector<1x8xf32>
    %103 = vector.broadcast %102 : vector<1x8xf32> to vector<16x8xf32>
    %104 = arith.addf %99, %103 : vector<16x8xf32>
    %c0_42 = arith.constant 0 : index
    %c0_43 = arith.constant 0 : index
    %c0_44 = arith.constant 0 : index
    %c0_45 = arith.constant 0 : index
    %105 = vector.load %arg11[%c0_42, %c0_43, %c0_44, %c0_45] : memref<1x4x16x8xf32, #tpu.memory_space<vmem>>, vector<1x1x16x8xf32>
    %106 = vector.shape_cast %105 : vector<1x1x16x8xf32> to vector<16x8xf32>
    %107 = vector.shape_cast %104 : vector<16x8xf32> to vector<1x1x16x8xf32>
    tpu.vector_store %arg11[%c0_42, %c0_43, %c0_44, %c0_45], %107 {strides = array<i32>} : memref<1x4x16x8xf32, #tpu.memory_space<vmem>>, vector<1x1x16x8xf32>,
    %c2 = arith.constant 2 : index
    %c0_46 = arith.constant 0 : index
    %c0_47 = arith.constant 0 : index
    %c0_48 = arith.constant 0 : index
    %108 = vector.load %arg7[%c2, %c0_46, %c0_47, %c0_48] : memref<3x4x32x8xf32, #tpu.memory_space<vmem>>, vector<1x1x32x8xf32>
    %109 = vector.shape_cast %108 : vector<1x1x32x8xf32> to vector<32x8xf32>
    %cst_49 = arith.constant dense<0.000000e+00> : vector<16x8xf32>
    %110 = tpu.matmul %84, %109, %cst_49 {dimension_numbers = #tpu.dot_dimension_numbers<[1], [0], [0], [1], [0, 0, 1, 1], [], []>} : vector<16x32xf32>, vector<32x8xf32>, vector<16x8xf32> -> vector<16x8xf32>
    %111 = vector.extract_strided_slice %85 {offsets = [2, 0, 0], sizes = [1, 1, 8], strides = [1, 1, 1]} : vector<3x4x8xf32> to vector<1x1x8xf32>
    %112 = vector.shape_cast %111 : vector<1x1x8xf32> to vector<8xf32>
    %113 = vector.shape_cast %112 : vector<8xf32> to vector<1x8xf32>
    %114 = vector.broadcast %113 : vector<1x8xf32> to vector<16x8xf32>
    %115 = arith.addf %110, %114 : vector<16x8xf32>
    %c0_50 = arith.constant 0 : index
    %c0_51 = arith.constant 0 : index
    %c0_52 = arith.constant 0 : index
    %c0_53 = arith.constant 0 : index
    %116 = vector.load %arg12[%c0_50, %c0_51, %c0_52, %c0_53] : memref<1x4x16x8xf32, #tpu.memory_space<vmem>>, vector<1x1x16x8xf32>
    %117 = vector.shape_cast %116 : vector<1x1x16x8xf32> to vector<16x8xf32>
    %118 = vector.shape_cast %115 : vector<16x8xf32> to vector<1x1x16x8xf32>
    tpu.vector_store %arg12[%c0_50, %c0_51, %c0_52, %c0_53], %118 {strides = array<i32>} : memref<1x4x16x8xf32, #tpu.memory_space<vmem>>, vector<1x1x16x8xf32>,
    %c0_54 = arith.constant 0 : index
    %c1_55 = arith.constant 1 : index
    %c0_56 = arith.constant 0 : index
    %c0_57 = arith.constant 0 : index
    %119 = vector.load %arg7[%c0_54, %c1_55, %c0_56, %c0_57] : memref<3x4x32x8xf32, #tpu.memory_space<vmem>>, vector<1x1x32x8xf32>
    %120 = vector.shape_cast %119 : vector<1x1x32x8xf32> to vector<32x8xf32>
    %cst_58 = arith.constant dense<0.000000e+00> : vector<16x8xf32>
    %121 = tpu.matmul %84, %120, %cst_58 {dimension_numbers = #tpu.dot_dimension_numbers<[1], [0], [0], [1], [0, 0, 1, 1], [], []>} : vector<16x32xf32>, vector<32x8xf32>, vector<16x8xf32> -> vector<16x8xf32>
    %122 = vector.extract_strided_slice %85 {offsets = [0, 1, 0], sizes = [1, 1, 8], strides = [1, 1, 1]} : vector<3x4x8xf32> to vector<1x1x8xf32>
    %123 = vector.shape_cast %122 : vector<1x1x8xf32> to vector<8xf32>
    %124 = vector.shape_cast %123 : vector<8xf32> to vector<1x8xf32>
    %125 = vector.broadcast %124 : vector<1x8xf32> to vector<16x8xf32>
    %126 = arith.addf %121, %125 : vector<16x8xf32>
    %c0_59 = arith.constant 0 : index
    %c1_60 = arith.constant 1 : index
    %c0_61 = arith.constant 0 : index
    %c0_62 = arith.constant 0 : index
    %127 = vector.load %arg10[%c0_59, %c1_60, %c0_61, %c0_62] : memref<1x4x16x8xf32, #tpu.memory_space<vmem>>, vector<1x1x16x8xf32>
    %128 = vector.shape_cast %127 : vector<1x1x16x8xf32> to vector<16x8xf32>
    %129 = vector.shape_cast %126 : vector<16x8xf32> to vector<1x1x16x8xf32>
    tpu.vector_store %arg10[%c0_59, %c1_60, %c0_61, %c0_62], %129 {strides = array<i32>} : memref<1x4x16x8xf32, #tpu.memory_space<vmem>>, vector<1x1x16x8xf32>,
    %c1_63 = arith.constant 1 : index
    %c1_64 = arith.constant 1 : index
    %c0_65 = arith.constant 0 : index
    %c0_66 = arith.constant 0 : index
    %130 = vector.load %arg7[%c1_63, %c1_64, %c0_65, %c0_66] : memref<3x4x32x8xf32, #tpu.memory_space<vmem>>, vector<1x1x32x8xf32>
    %131 = vector.shape_cast %130 : vector<1x1x32x8xf32> to vector<32x8xf32>
    %cst_67 = arith.constant dense<0.000000e+00> : vector<16x8xf32>
    %132 = tpu.matmul %84, %131, %cst_67 {dimension_numbers = #tpu.dot_dimension_numbers<[1], [0], [0], [1], [0, 0, 1, 1], [], []>} : vector<16x32xf32>, vector<32x8xf32>, vector<16x8xf32> -> vector<16x8xf32>
    %133 = vector.extract_strided_slice %85 {offsets = [1, 1, 0], sizes = [1, 1, 8], strides = [1, 1, 1]} : vector<3x4x8xf32> to vector<1x1x8xf32>
    %134 = vector.shape_cast %133 : vector<1x1x8xf32> to vector<8xf32>
    %135 = vector.shape_cast %134 : vector<8xf32> to vector<1x8xf32>
    %136 = vector.broadcast %135 : vector<1x8xf32> to vector<16x8xf32>
    %137 = arith.addf %132, %136 : vector<16x8xf32>
    %c0_68 = arith.constant 0 : index
    %c1_69 = arith.constant 1 : index
    %c0_70 = arith.constant 0 : index
    %c0_71 = arith.constant 0 : index
    %138 = vector.load %arg11[%c0_68, %c1_69, %c0_70, %c0_71] : memref<1x4x16x8xf32, #tpu.memory_space<vmem>>, vector<1x1x16x8xf32>
    %139 = vector.shape_cast %138 : vector<1x1x16x8xf32> to vector<16x8xf32>
    %140 = vector.shape_cast %137 : vector<16x8xf32> to vector<1x1x16x8xf32>
    tpu.vector_store %arg11[%c0_68, %c1_69, %c0_70, %c0_71], %140 {strides = array<i32>} : memref<1x4x16x8xf32, #tpu.memory_space<vmem>>, vector<1x1x16x8xf32>,
    %c2_72 = arith.constant 2 : index
    %c1_73 = arith.constant 1 : index
    %c0_74 = arith.constant 0 : index
    %c0_75 = arith.constant 0 : index
    %141 = vector.load %arg7[%c2_72, %c1_73, %c0_74, %c0_75] : memref<3x4x32x8xf32, #tpu.memory_space<vmem>>, vector<1x1x32x8xf32>
    %142 = vector.shape_cast %141 : vector<1x1x32x8xf32> to vector<32x8xf32>
    %cst_76 = arith.constant dense<0.000000e+00> : vector<16x8xf32>
    %143 = tpu.matmul %84, %142, %cst_76 {dimension_numbers = #tpu.dot_dimension_numbers<[1], [0], [0], [1], [0, 0, 1, 1], [], []>} : vector<16x32xf32>, vector<32x8xf32>, vector<16x8xf32> -> vector<16x8xf32>
    %144 = vector.extract_strided_slice %85 {offsets = [2, 1, 0], sizes = [1, 1, 8], strides = [1, 1, 1]} : vector<3x4x8xf32> to vector<1x1x8xf32>
    %145 = vector.shape_cast %144 : vector<1x1x8xf32> to vector<8xf32>
    %146 = vector.shape_cast %145 : vector<8xf32> to vector<1x8xf32>
    %147 = vector.broadcast %146 : vector<1x8xf32> to vector<16x8xf32>
    %148 = arith.addf %143, %147 : vector<16x8xf32>
    %c0_77 = arith.constant 0 : index
    %c1_78 = arith.constant 1 : index
    %c0_79 = arith.constant 0 : index
    %c0_80 = arith.constant 0 : index
    %149 = vector.load %arg12[%c0_77, %c1_78, %c0_79, %c0_80] : memref<1x4x16x8xf32, #tpu.memory_space<vmem>>, vector<1x1x16x8xf32>
    %150 = vector.shape_cast %149 : vector<1x1x16x8xf32> to vector<16x8xf32>
    %151 = vector.shape_cast %148 : vector<16x8xf32> to vector<1x1x16x8xf32>
    tpu.vector_store %arg12[%c0_77, %c1_78, %c0_79, %c0_80], %151 {strides = array<i32>} : memref<1x4x16x8xf32, #tpu.memory_space<vmem>>, vector<1x1x16x8xf32>,
    %c0_81 = arith.constant 0 : index
    %c2_82 = arith.constant 2 : index
    %c0_83 = arith.constant 0 : index
    %c0_84 = arith.constant 0 : index
    %152 = vector.load %arg7[%c0_81, %c2_82, %c0_83, %c0_84] : memref<3x4x32x8xf32, #tpu.memory_space<vmem>>, vector<1x1x32x8xf32>
    %153 = vector.shape_cast %152 : vector<1x1x32x8xf32> to vector<32x8xf32>
    %cst_85 = arith.constant dense<0.000000e+00> : vector<16x8xf32>
    %154 = tpu.matmul %84, %153, %cst_85 {dimension_numbers = #tpu.dot_dimension_numbers<[1], [0], [0], [1], [0, 0, 1, 1], [], []>} : vector<16x32xf32>, vector<32x8xf32>, vector<16x8xf32> -> vector<16x8xf32>
    %155 = vector.extract_strided_slice %85 {offsets = [0, 2, 0], sizes = [1, 1, 8], strides = [1, 1, 1]} : vector<3x4x8xf32> to vector<1x1x8xf32>
    %156 = vector.shape_cast %155 : vector<1x1x8xf32> to vector<8xf32>
    %157 = vector.shape_cast %156 : vector<8xf32> to vector<1x8xf32>
    %158 = vector.broadcast %157 : vector<1x8xf32> to vector<16x8xf32>
    %159 = arith.addf %154, %158 : vector<16x8xf32>
    %c0_86 = arith.constant 0 : index
    %c2_87 = arith.constant 2 : index
    %c0_88 = arith.constant 0 : index
    %c0_89 = arith.constant 0 : index
    %160 = vector.load %arg10[%c0_86, %c2_87, %c0_88, %c0_89] : memref<1x4x16x8xf32, #tpu.memory_space<vmem>>, vector<1x1x16x8xf32>
    %161 = vector.shape_cast %160 : vector<1x1x16x8xf32> to vector<16x8xf32>
    %162 = vector.shape_cast %159 : vector<16x8xf32> to vector<1x1x16x8xf32>
    tpu.vector_store %arg10[%c0_86, %c2_87, %c0_88, %c0_89], %162 {strides = array<i32>} : memref<1x4x16x8xf32, #tpu.memory_space<vmem>>, vector<1x1x16x8xf32>,
    %c1_90 = arith.constant 1 : index
    %c2_91 = arith.constant 2 : index
    %c0_92 = arith.constant 0 : index
    %c0_93 = arith.constant 0 : index
    %163 = vector.load %arg7[%c1_90, %c2_91, %c0_92, %c0_93] : memref<3x4x32x8xf32, #tpu.memory_space<vmem>>, vector<1x1x32x8xf32>
    %164 = vector.shape_cast %163 : vector<1x1x32x8xf32> to vector<32x8xf32>
    %cst_94 = arith.constant dense<0.000000e+00> : vector<16x8xf32>
    %165 = tpu.matmul %84, %164, %cst_94 {dimension_numbers = #tpu.dot_dimension_numbers<[1], [0], [0], [1], [0, 0, 1, 1], [], []>} : vector<16x32xf32>, vector<32x8xf32>, vector<16x8xf32> -> vector<16x8xf32>
    %166 = vector.extract_strided_slice %85 {offsets = [1, 2, 0], sizes = [1, 1, 8], strides = [1, 1, 1]} : vector<3x4x8xf32> to vector<1x1x8xf32>
    %167 = vector.shape_cast %166 : vector<1x1x8xf32> to vector<8xf32>
    %168 = vector.shape_cast %167 : vector<8xf32> to vector<1x8xf32>
    %169 = vector.broadcast %168 : vector<1x8xf32> to vector<16x8xf32>
    %170 = arith.addf %165, %169 : vector<16x8xf32>
    %c0_95 = arith.constant 0 : index
    %c2_96 = arith.constant 2 : index
    %c0_97 = arith.constant 0 : index
    %c0_98 = arith.constant 0 : index
    %171 = vector.load %arg11[%c0_95, %c2_96, %c0_97, %c0_98] : memref<1x4x16x8xf32, #tpu.memory_space<vmem>>, vector<1x1x16x8xf32>
    %172 = vector.shape_cast %171 : vector<1x1x16x8xf32> to vector<16x8xf32>
    %173 = vector.shape_cast %170 : vector<16x8xf32> to vector<1x1x16x8xf32>
    tpu.vector_store %arg11[%c0_95, %c2_96, %c0_97, %c0_98], %173 {strides = array<i32>} : memref<1x4x16x8xf32, #tpu.memory_space<vmem>>, vector<1x1x16x8xf32>,
    %c2_99 = arith.constant 2 : index
    %c2_100 = arith.constant 2 : index
    %c0_101 = arith.constant 0 : index
    %c0_102 = arith.constant 0 : index
    %174 = vector.load %arg7[%c2_99, %c2_100, %c0_101, %c0_102] : memref<3x4x32x8xf32, #tpu.memory_space<vmem>>, vector<1x1x32x8xf32>
    %175 = vector.shape_cast %174 : vector<1x1x32x8xf32> to vector<32x8xf32>
    %cst_103 = arith.constant dense<0.000000e+00> : vector<16x8xf32>
    %176 = tpu.matmul %84, %175, %cst_103 {dimension_numbers = #tpu.dot_dimension_numbers<[1], [0], [0], [1], [0, 0, 1, 1], [], []>} : vector<16x32xf32>, vector<32x8xf32>, vector<16x8xf32> -> vector<16x8xf32>
    %177 = vector.extract_strided_slice %85 {offsets = [2, 2, 0], sizes = [1, 1, 8], strides = [1, 1, 1]} : vector<3x4x8xf32> to vector<1x1x8xf32>
    %178 = vector.shape_cast %177 : vector<1x1x8xf32> to vector<8xf32>
    %179 = vector.shape_cast %178 : vector<8xf32> to vector<1x8xf32>
    %180 = vector.broadcast %179 : vector<1x8xf32> to vector<16x8xf32>
    %181 = arith.addf %176, %180 : vector<16x8xf32>
    %c0_104 = arith.constant 0 : index
    %c2_105 = arith.constant 2 : index
    %c0_106 = arith.constant 0 : index
    %c0_107 = arith.constant 0 : index
    %182 = vector.load %arg12[%c0_104, %c2_105, %c0_106, %c0_107] : memref<1x4x16x8xf32, #tpu.memory_space<vmem>>, vector<1x1x16x8xf32>
    %183 = vector.shape_cast %182 : vector<1x1x16x8xf32> to vector<16x8xf32>
    %184 = vector.shape_cast %181 : vector<16x8xf32> to vector<1x1x16x8xf32>
    tpu.vector_store %arg12[%c0_104, %c2_105, %c0_106, %c0_107], %184 {strides = array<i32>} : memref<1x4x16x8xf32, #tpu.memory_space<vmem>>, vector<1x1x16x8xf32>,
    %c0_108 = arith.constant 0 : index
    %c3 = arith.constant 3 : index
    %c0_109 = arith.constant 0 : index
    %c0_110 = arith.constant 0 : index
    %185 = vector.load %arg7[%c0_108, %c3, %c0_109, %c0_110] : memref<3x4x32x8xf32, #tpu.memory_space<vmem>>, vector<1x1x32x8xf32>
    %186 = vector.shape_cast %185 : vector<1x1x32x8xf32> to vector<32x8xf32>
    %cst_111 = arith.constant dense<0.000000e+00> : vector<16x8xf32>
    %187 = tpu.matmul %84, %186, %cst_111 {dimension_numbers = #tpu.dot_dimension_numbers<[1], [0], [0], [1], [0, 0, 1, 1], [], []>} : vector<16x32xf32>, vector<32x8xf32>, vector<16x8xf32> -> vector<16x8xf32>
    %188 = vector.extract_strided_slice %85 {offsets = [0, 3, 0], sizes = [1, 1, 8], strides = [1, 1, 1]} : vector<3x4x8xf32> to vector<1x1x8xf32>
    %189 = vector.shape_cast %188 : vector<1x1x8xf32> to vector<8xf32>
    %190 = vector.shape_cast %189 : vector<8xf32> to vector<1x8xf32>
    %191 = vector.broadcast %190 : vector<1x8xf32> to vector<16x8xf32>
    %192 = arith.addf %187, %191 : vector<16x8xf32>
    %c0_112 = arith.constant 0 : index
    %c3_113 = arith.constant 3 : index
    %c0_114 = arith.constant 0 : index
    %c0_115 = arith.constant 0 : index
    %193 = vector.load %arg10[%c0_112, %c3_113, %c0_114, %c0_115] : memref<1x4x16x8xf32, #tpu.memory_space<vmem>>, vector<1x1x16x8xf32>
    %194 = vector.shape_cast %193 : vector<1x1x16x8xf32> to vector<16x8xf32>
    %195 = vector.shape_cast %192 : vector<16x8xf32> to vector<1x1x16x8xf32>
    tpu.vector_store %arg10[%c0_112, %c3_113, %c0_114, %c0_115], %195 {strides = array<i32>} : memref<1x4x16x8xf32, #tpu.memory_space<vmem>>, vector<1x1x16x8xf32>,
    %c1_116 = arith.constant 1 : index
    %c3_117 = arith.constant 3 : index
    %c0_118 = arith.constant 0 : index
    %c0_119 = arith.constant 0 : index
    %196 = vector.load %arg7[%c1_116, %c3_117, %c0_118, %c0_119] : memref<3x4x32x8xf32, #tpu.memory_space<vmem>>, vector<1x1x32x8xf32>
    %197 = vector.shape_cast %196 : vector<1x1x32x8xf32> to vector<32x8xf32>
    %cst_120 = arith.constant dense<0.000000e+00> : vector<16x8xf32>
    %198 = tpu.matmul %84, %197, %cst_120 {dimension_numbers = #tpu.dot_dimension_numbers<[1], [0], [0], [1], [0, 0, 1, 1], [], []>} : vector<16x32xf32>, vector<32x8xf32>, vector<16x8xf32> -> vector<16x8xf32>
    %199 = vector.extract_strided_slice %85 {offsets = [1, 3, 0], sizes = [1, 1, 8], strides = [1, 1, 1]} : vector<3x4x8xf32> to vector<1x1x8xf32>
    %200 = vector.shape_cast %199 : vector<1x1x8xf32> to vector<8xf32>
    %201 = vector.shape_cast %200 : vector<8xf32> to vector<1x8xf32>
    %202 = vector.broadcast %201 : vector<1x8xf32> to vector<16x8xf32>
    %203 = arith.addf %198, %202 : vector<16x8xf32>
    %c0_121 = arith.constant 0 : index
    %c3_122 = arith.constant 3 : index
    %c0_123 = arith.constant 0 : index
    %c0_124 = arith.constant 0 : index
    %204 = vector.load %arg11[%c0_121, %c3_122, %c0_123, %c0_124] : memref<1x4x16x8xf32, #tpu.memory_space<vmem>>, vector<1x1x16x8xf32>
    %205 = vector.shape_cast %204 : vector<1x1x16x8xf32> to vector<16x8xf32>
    %206 = vector.shape_cast %203 : vector<16x8xf32> to vector<1x1x16x8xf32>
    tpu.vector_store %arg11[%c0_121, %c3_122, %c0_123, %c0_124], %206 {strides = array<i32>} : memref<1x4x16x8xf32, #tpu.memory_space<vmem>>, vector<1x1x16x8xf32>,
    %c2_125 = arith.constant 2 : index
    %c3_126 = arith.constant 3 : index
    %c0_127 = arith.constant 0 : index
    %c0_128 = arith.constant 0 : index
    %207 = vector.load %arg7[%c2_125, %c3_126, %c0_127, %c0_128] : memref<3x4x32x8xf32, #tpu.memory_space<vmem>>, vector<1x1x32x8xf32>
    %208 = vector.shape_cast %207 : vector<1x1x32x8xf32> to vector<32x8xf32>
    %cst_129 = arith.constant dense<0.000000e+00> : vector<16x8xf32>
    %209 = tpu.matmul %84, %208, %cst_129 {dimension_numbers = #tpu.dot_dimension_numbers<[1], [0], [0], [1], [0, 0, 1, 1], [], []>} : vector<16x32xf32>, vector<32x8xf32>, vector<16x8xf32> -> vector<16x8xf32>
    %210 = vector.extract_strided_slice %85 {offsets = [2, 3, 0], sizes = [1, 1, 8], strides = [1, 1, 1]} : vector<3x4x8xf32> to vector<1x1x8xf32>
    %211 = vector.shape_cast %210 : vector<1x1x8xf32> to vector<8xf32>
    %212 = vector.shape_cast %211 : vector<8xf32> to vector<1x8xf32>
    %213 = vector.broadcast %212 : vector<1x8xf32> to vector<16x8xf32>
    %214 = arith.addf %209, %213 : vector<16x8xf32>
    %c0_130 = arith.constant 0 : index
    %c3_131 = arith.constant 3 : index
    %c0_132 = arith.constant 0 : index
    %c0_133 = arith.constant 0 : index
    %215 = vector.load %arg12[%c0_130, %c3_131, %c0_132, %c0_133] : memref<1x4x16x8xf32, #tpu.memory_space<vmem>>, vector<1x1x16x8xf32>
    %216 = vector.shape_cast %215 : vector<1x1x16x8xf32> to vector<16x8xf32>
    %217 = vector.shape_cast %214 : vector<16x8xf32> to vector<1x1x16x8xf32>
    tpu.vector_store %arg12[%c0_130, %c3_131, %c0_132, %c0_133], %217 {strides = array<i32>} : memref<1x4x16x8xf32, #tpu.memory_space<vmem>>, vector<1x1x16x8xf32>,
    return
  }
  func.func @transform_0(%arg0: i32, %arg1: i32) -> (i32, i32, i32) {
    %c0_i32 = arith.constant 0 : i32
    %c0_i32_0 = arith.constant 0 : i32
    return %arg0, %arg1, %c0_i32 : i32, i32, i32
  }
  func.func @transform_1(%arg0: i32, %arg1: i32) -> (i32, i32) {
    %c0_i32 = arith.constant 0 : i32
    %c0_i32_0 = arith.constant 0 : i32
    %c0_i32_1 = arith.constant 0 : i32
    return %c0_i32, %c0_i32_0 : i32, i32
  }
  func.func @transform_2(%arg0: i32, %arg1: i32) -> (i32, i32) {
    %c0_i32 = arith.constant 0 : i32
    %c0_i32_0 = arith.constant 0 : i32
    %c0_i32_1 = arith.constant 0 : i32
    return %c0_i32, %c0_i32_0 : i32, i32
  }
  func.func @transform_3(%arg0: i32, %arg1: i32) -> (i32, i32) {
    %c0_i32 = arith.constant 0 : i32
    %c0_i32_0 = arith.constant 0 : i32
    %c0_i32_1 = arith.constant 0 : i32
    return %c0_i32, %c0_i32_0 : i32, i32
  }
  func.func @transform_4(%arg0: i32, %arg1: i32) -> (i32, i32) {
    %c0_i32 = arith.constant 0 : i32
    %c0_i32_0 = arith.constant 0 : i32
    %c0_i32_1 = arith.constant 0 : i32
    return %c0_i32, %c0_i32_0 : i32, i32
  }
  func.func @transform_5(%arg0: i32, %arg1: i32) -> (i32, i32, i32, i32) {
    %c0_i32 = arith.constant 0 : i32
    %c0_i32_0 = arith.constant 0 : i32
    %c0_i32_1 = arith.constant 0 : i32
    %c0_i32_2 = arith.constant 0 : i32
    %c0_i32_3 = arith.constant 0 : i32
    return %c0_i32, %c0_i32_0, %c0_i32_1, %c0_i32_2 : i32, i32, i32, i32
  }
  func.func @transform_6(%arg0: i32, %arg1: i32) -> (i32, i32, i32) {
    %c0_i32 = arith.constant 0 : i32
    %c0_i32_0 = arith.constant 0 : i32
    %c0_i32_1 = arith.constant 0 : i32
    %c0_i32_2 = arith.constant 0 : i32
    return %c0_i32, %c0_i32_0, %c0_i32_1 : i32, i32, i32
  }
  func.func @transform_7(%arg0: i32, %arg1: i32) -> (i32, i32, i32) {
    %c0_i32 = arith.constant 0 : i32
    %c0_i32_0 = arith.constant 0 : i32
    return %arg0, %arg1, %c0_i32 : i32, i32, i32
  }
  func.func @transform_8(%arg0: i32, %arg1: i32) -> (i32, i32, i32, i32) {
    %c0_i32 = arith.constant 0 : i32
    %c0_i32_0 = arith.constant 0 : i32
    %c0_i32_1 = arith.constant 0 : i32
    return %arg0, %c0_i32, %arg1, %c0_i32_0 : i32, i32, i32, i32
  }
  func.func @transform_9(%arg0: i32, %arg1: i32) -> (i32, i32, i32, i32) {
    %c0_i32 = arith.constant 0 : i32
    %c0_i32_0 = arith.constant 0 : i32
    %c0_i32_1 = arith.constant 0 : i32
    return %arg0, %c0_i32, %arg1, %c0_i32_0 : i32, i32, i32, i32
  }
  func.func @transform_10(%arg0: i32, %arg1: i32) -> (i32, i32, i32, i32) {
    %c0_i32 = arith.constant 0 : i32
    %c0_i32_0 = arith.constant 0 : i32
    %c0_i32_1 = arith.constant 0 : i32
    return %arg0, %c0_i32, %arg1, %c0_i32_0 : i32, i32, i32, i32
  }
}

</mosaic_0001>

<bundles_post_ra>
// kernel: tpu_custom_call.1
= control target key start
LH: loop header
LB: loop body
LE: loop exit
PB: predicated region body
PF: predicated region fallthrough
CT: control target
= control target key end

     0   :  { %s3178_s0 = inlined_call_operand.vmem [shape: f32[2,16,32], index: 0, kind: input, shape index: {}]   ;;  %s3179_s1 = inlined_call_operand.vmem [shape: f32[5,32], index: 1, kind: input, shape index: {}]   ;;  %s3180_s2 = inlined_call_operand.vmem [shape: f32[1,128], index: 2, kind: input, shape index: {}]   ;;  %s3181_s3 = inlined_call_operand.vmem [shape: f32[32,128], index: 3, kind: input, shape index: {}]   ;;  %s3182_s4 = inlined_call_operand.vmem [shape: f32[128,32], index: 4, kind: input, shape index: {}]   ;;  %s3183_s5 = inlined_call_operand.vmem [shape: f32[3,4,32,8], index: 5, kind: input, shape index: {}]   ;;  %s3184_s6 = inlined_call_operand.vmem [shape: f32[3,4,8], index: 6, kind: input, shape index: {}]   ;;  %s3185_s7 = inlined_call_operand.hbm [shape: f32[2,16,32], index: 7, kind: output, shape index: {0}]   ;;  %s3186_s8 = inlined_call_operand.vmem [shape: f32[2,4,16,8], index: 8, kind: output, shape index: {1}]   ;;  %s3187_s9 = inlined_call_operand.vmem [shape: f32[2,4,16,8], index: 9, kind: output, shape index: {2}]   ;;  %s3188_s10 = inlined_call_operand.vmem [shape: f32[2,4,16,8], index: 10, kind: output, shape index: {3}]  }
   0x1   :  { %3190 = sst [smem:[#allocation5_spill]] %s3178_s0 }
   0x2   :  { %3191 = sst [smem:[#allocation6_spill]] %s3179_s1 }
   0x3   :  { %16 = vsyncpa [#allocation3], 0 }
   0x4   :  { %18 = vsyncpa [#allocation3 + $0x1], 0  ;;  %s2640_s13 = smov 0   ;;  %s2642_s14 = smov 0  }
   0x5   :  { %s2644_s15 = smov 0   ;;  %s2646_s16 = smov 0  }
   0x6   :  { %s2648_s17 = smov 0   ;;  %s2650_s18 = smov 0  }
   0x7 LB: > { %s2042_s19 = sadd.s32 4294967295, %s2580_s18   ;;  %s2043_s20 = sadd.s32 4294967294, %s2580_s18   ;;  %s2580_s18 = sphi %s2650_s18, %s24_s18   ;;  %s2576_s17 = sphi %s2648_s17, %s3201_s17   ;;  %s2572_s16 = sphi %s2646_s16, %s3200_s16   ;;  %s2568_s15 = sphi %s2644_s15, %s3199_s15   ;;  %s2564_s14 = sphi %s2642_s14, %s3198_s14   ;;  %s2560_s13 = sphi %s2640_s13, %s3197_s13  }
   0x8   : > { %s36_s21 = sadd.s32 1, %s2576_s17  ;;  %s199_s22 = sadd.s32 1, %s2568_s15 }
   0x9   : > { %p38_p0 = scmp.ge.s32.totalorder %s36_s21, 2  ;;  %p209_p1 = scmp.ne.s32.totalorder %s2568_s15, %s2564_s14 }
   0xa   : > { %p210_p2 = scmp.eq.s32.totalorder %s2042_s19, 1  ;;  %p215_p3 = scmp.ne.s32.totalorder %s2564_s14, %s2560_s13 }
   0xb   : > { %s3203_s21 = smov (%p38_p0, %s36_s21), 0  ;;  %p216_p5 = scmp.eq.s32.totalorder %s2043_s20, 1 }
   0xc   : > { %p2680_p4 = por %p210_p2, %p209_p1  ;;  %s194_s24 = ssub.s32 %s2576_s17, %s3203_s21 }
   0xd   : > { %p2046_p6 = scmp.ge.s32.totalorder %s2580_s18, 1  ;;  %p197_p7 = scmp.eq.s32.totalorder %s194_s24, 0 }
   0xe   : > { %p2687_p8 = por %p216_p5, %p215_p3  ;;  %p349_p9 = scmp.lt.s32.totalorder %s2580_s18, 3 }
   0xf   : > { %s2693_s26 = scalar_select %p197_p7, %s2568_s15, %s199_s22  }
  0x10   : > { %p350_p10 = pnand %p2046_p6, %p349_p9 }
  0x11   : > { %p419_p11 = scmp.lt.s32.totalorder (!%p350_p10), %s2572_s16, 1  ;;  %s3194_s0 = sld [smem:[#allocation5_spill]] (!%p350_p10) }
  0x12   : > { %353 = sbr.rel (%p350_p10) target bundleno = 1341 (0x53d), region = 48  ;;  %s3195_s1 = sld [smem:[#allocation6_spill]] (!%p350_p10) }
  0x13   : > { %s2156_s20 = sshll.u32 (!%p350_p10), %s2572_s16, 8  ;;  %s3196_s30 = sand.u32 (!%p350_p10), 1, %s2564_s14  }
  0x14   : > { %s3025_s29 = scalar_lea.hbm (!%p350_p10), %s3185_s7, %s2156_s20 }
  0x17   : > { %s2697_s27 = scalar_select %p419_p11, %s2572_s16, 1  ;;  %vm462_vm0 = vcmask 261120   ;;  %v505_v14 = vld [vmem:[%s3181_s3 + $0x18] sm:$0xff]  ;;  %v504_v15 = vld [vmem:[%s3181_s3 + $0x10] sm:$0xff]  ;;  %v503_v16 = vld [vmem:[%s3181_s3 + $0x8] sm:$0xff]  ;;  %v490_v23 = vlaneseq }
  0x18   : > { %2253 = vmatprep.subr.mxu0 %v505_v14  ;;  %v502_v17 = vld [vmem:[%s3181_s3] sm:$0xff]  ;;  %v623_v39 = vld [vmem:[%s3182_s4 + $0x78] sm:$0xff]  ;;  %v622_v40 = vld [vmem:[%s3182_s4 + $0x70] sm:$0xff]  ;;  %s2582_s16 = smov [#allocation2]  }
  0x19   : > { %s2152_s28 = sshll.u32 %s2697_s27, 4  ;;  %2254 = vmatpush3.msra.mxu0 %v505_v14  ;;  %v2727_v25 = vshrl.u32 %v490_v23, 7  ;;  %v2735_v27 = vld [vmem:[%s3195_s1] sm:$0x1f]  ;;  %2264 = vmatprep.subr.mxu1 %v623_v39  ;;  %v621_v41 = vld [vmem:[%s3182_s4 + $0x68] sm:$0xff]  ;;  %v619_v43 = vld [vmem:[%s3182_s4 + $0x58] sm:$0xff] }
  0x1a   : > { %s426_s11 = scalar_lea.vmem %s3194_s0, %s2152_s28  ;;  %2255 = vmatprep.subr.mxu0 %v504_v15  ;;  %2265 = vmatpush3.msra.mxu1 %v623_v39  ;;  %v620_v42 = vld [vmem:[%s3182_s4 + $0x60] sm:$0xff]  ;;  %v618_v44 = vld [vmem:[%s3182_s4 + $0x50] sm:$0xff]  ;;  %v617_v45 = vld [vmem:[%s3182_s4 + $0x48] sm:$0xff] }
  0x1b   : > { %v2703_v0 = vld [vmem:[%s426_s11] sm:$0xff]  ;;  %v2705_v1 = vld [vmem:[%s426_s11 + $0x8] sm:$0xff]  ;;  %2256 = vmatpush3.msra.mxu0 %v504_v15  ;;  %v2730_v26 = vsub.s32 0, %v2727_v25  ;;  %v2738_v28 = vsub.s32 1, %v2727_v25  ;;  %2266 = vmatprep.subr.mxu1 %v622_v40  ;;  %v615_v47 = vld [vmem:[%s3182_s4 + $0x38] sm:$0xff]  ;;  %s3189_s11 = sand.u32 1, %s2564_s14  }
  0x1c   : > { %v463_v2 = vsel %vm462_vm0, %v2703_v0, 0.0  ;;  %v466_v3 = vsel %vm462_vm0, %v2705_v1, 0.0  ;;  %2257 = vmatprep.subr.mxu0 %v503_v16  ;;  %2267 = vmatpush3.msra.mxu1 %v622_v40  ;;  %v616_v46 = vld [vmem:[%s3182_s4 + $0x40] sm:$0xff]  ;;  %v614_v48 = vld [vmem:[%s3182_s4 + $0x30] sm:$0xff]  ;;  %v613_v49 = vld [vmem:[%s3182_s4 + $0x28] sm:$0xff]  ;;  %s2047_s12 = sshll.u32 %s3189_s11, 4 }
  0x1d   : > { %464 = vadd.xlane.f32.xlu0 %v463_v2  ;;  %2258 = vmatpush3.msra.mxu0 %v503_v16  ;;  %v493_v29 = vrot.slane %v2735_v27, %v2730_v26  ;;  %v499_v32 = vrot.slane %v2735_v27, %v2738_v28  ;;  %v612_v50 = vld [vmem:[%s3182_s4 + $0x20] sm:$0xff]  ;;  %v611_v51 = vld [vmem:[%s3182_s4 + $0x18] sm:$0xff]  ;;  %v610_v52 = vld [vmem:[%s3182_s4 + $0x10] sm:$0xff]  ;;  %s2806_s19 = scalar_lea.vmem [#allocation2], %s2047_s12  ;;  %s3031_s11 = scalar_lea.sflag [#allocation3], %s3196_s30 }
  0x1e   : > { %2259 = vmatprep.subr.mxu0 %v502_v17  ;;  %2268 = vmatprep.subr.mxu1 %v621_v41  ;;  %v609_v53 = vld [vmem:[%s3182_s4 + $0x8] sm:$0xff]  ;;  %v608_v54 = vld [vmem:[%s3182_s4] sm:$0xff]  ;;  %v2066_v40 = vld [vmem:[%s3183_s5 + $0x98] sm:$0xff]  ;;  %s1840_s22 = sshll.u32 %s2806_s19, 4  ;;  %s3027_s22 = int_to_ptr.vmem [resolvable:$true] %s1840_s22 }
  0x1f   : > { %2260 = vmatpush3.msra.mxu0 %v502_v17  ;;  %2269 = vmatpush3.msra.mxu1 %v621_v41  ;;  %v2056_v55 = vld [vmem:[%s3180_s2] ss:$0 sm:$0xff]  ;;  %v2102_v41 = vld [vmem:[%s3183_s5 + $0x58] sm:$0xff]  ;;  %s2504_s12 = scalar_lea.vmem %s3027_s22, 256 }
  0x20   : > { %2270 = vmatprep.subr.mxu1 %v620_v42  ;;  %v2083_v39 = vld [vmem:[%s3183_s5 + $0xa0] sm:$0xff]  ;;  %p2505_p12 = scmp.ne.s32.totalorder %s3027_s22, %s2504_s12 }
  0x21   : > { %467 = vadd.xlane.f32.xlu0 %v466_v3  ;;  %2271 = vmatpush3.msra.mxu1 %v620_v42 }
  0x22   : > { %2272 = vmatprep.subr.mxu1 %v619_v43  ;;  %p2506_p13 = pnand %p2505_p12, %p2680_p4 }
  0x23   : > { %2273 = vmatpush3.msra.mxu1 %v619_v43 }
  0x24   : > { %2274 = vmatprep.subr.mxu1 %v618_v44  ;;  %p2507_p0 = pneg %p2506_p13 }
  0x25   : > { %2275 = vmatpush3.msra.mxu1 %v618_v44 }
  0x26   : > { %2276 = vmatprep.subr.mxu1 %v617_v45 }
  0x27   : > { %2277 = vmatpush3.msra.mxu1 %v617_v45 }
  0x28   : > { %2278 = vmatprep.subr.mxu1 %v616_v46 }
  0x29   : > { %2279 = vmatpush3.msra.mxu1 %v616_v46 }
  0x2a   : > { %2280 = vmatprep.subr.mxu1 %v615_v47 }
  0x2b   : > { %2281 = vmatpush3.msra.mxu1 %v615_v47 }
  0x2c   : > { %2282 = vmatprep.subr.mxu1 %v614_v48 }
  0x2d   : > { %2283 = vmatpush3.msra.mxu1 %v614_v48  ;;  %v2848_v48 = vsub.s32 3, %v2727_v25 }
  0x2e   : > { %2284 = vmatprep.subr.mxu1 %v613_v49 }
  0x2f   : > { %2285 = vmatpush3.msra.mxu1 %v613_v49 }
  0x30   : > { %2286 = vmatprep.subr.mxu1 %v612_v50 }
  0x31   : > { %2287 = vmatpush3.msra.mxu1 %v612_v50  ;;  %v738_v50 = vrot.slane %v2735_v27, %v2848_v48 }
  0x32   : > { %2288 = vmatprep.subr.mxu1 %v611_v51 }
  0x33   : > { %2289 = vmatpush3.msra.mxu1 %v611_v51  ;;  %v743_v51 = vsub.s32 4, %v2727_v25 }
  0x34   : > { %2290 = vmatprep.subr.mxu1 %v610_v52 }
  0x35   : > { %2291 = vmatpush3.msra.mxu1 %v610_v52 }
  0x36   : > { %2292 = vmatprep.subr.mxu1 %v609_v53 }
  0x37   : > { %2293 = vmatpush3.msra.mxu1 %v609_v53 }
  0x38   : > { %2294 = vmatprep.subr.mxu1 %v608_v54 }
  0x39   : > { %2295 = vmatpush3.msra.mxu1 %v608_v54 }
  0xa6   : > { %v465_v4 = vpop.xlane.xlu0 %464 }
  0xa7   : > { %v470_v5 = vmul.f32 0.03125, %v465_v4 }
  0xa9   : > { %v472_v6 = vsub.f32 %v2703_v0, %v470_v5 }
  0xaa   : > { %v468_v7 = vpop.xlane.xlu0 %467 }
  0xab   : > { %v471_v8 = vmul.f32 0.03125, %v468_v7  ;;  %v474_v9 = vmul.f32 %v472_v6, %v472_v6 }
  0xad   : > { %v473_v10 = vsub.f32 %v2705_v1, %v471_v8  ;;  %v476_v11 = vsel %vm462_vm0, %v474_v9, 0.0  ;;  %v2798_v8 = vsub.s32 2, %v2727_v25  ;;  %v2065_v25 = vld [vmem:[%s3183_s5 + $0x90] sm:$0xff] }
  0xae   : > { %477 = vadd.xlane.f32.xlu1 %v476_v11 }
  0xaf   : > { %v475_v12 = vmul.f32 %v473_v10, %v473_v10  ;;  %v627_v9 = vrot.slane %v2735_v27, %v2798_v8 }
  0xb1   : > { %v479_v13 = vsel %vm462_vm0, %v475_v12, 0.0 }
  0xb2   : > { %480 = vadd.xlane.f32.xlu1 %v479_v13 }
 0x137   : > { %v478_v18 = vpop.xlane.xlu1 %477 }
 0x138   : > { %v482_v19 = vmul.f32 0.03125, %v478_v18 }
 0x13a   : > { %v484_v20 = vadd.f32 1e-05, %v482_v19 }
 0x13b   : > { %v481_v21 = vpop.xlane.xlu1 %480 }
 0x13c   : > { %2488 = vrsqrt.f32 %v484_v20  ;;  %v483_v22 = vmul.f32 0.03125, %v481_v21 }
 0x13e   : > { %v485_v24 = vadd.f32 1e-05, %v483_v22 }
 0x140   : > { %2490 = vrsqrt.f32 %v485_v24 }
 0x149   : > { %v2489_v30 = vpop.eup %2488 }
 0x14a   : > { %v488_v31 = vmul.f32 %v2489_v30, %v472_v6 }
 0x14c   : > { %v494_v33 = vmul.f32 %v493_v29, %v488_v31 }
 0x14d   : > { %v2491_v34 = vpop.eup %2490 }
 0x14e   : > { %v489_v35 = vmul.f32 %v2491_v34, %v473_v10  ;;  %v500_v36 = vadd.f32 %v499_v32, %v494_v33  ;;  %v2086_v33 = vld [vmem:[%s3183_s5 + $0xb8] sm:$0xff]  ;;  %v752_v34 = vld [vmem:[%s3183_s5 + $0x10] sm:$0xff] }
 0x14f   : > { %2343 = vmatprep.subr.mxu1 %v2086_v33 }
 0x150   : > { %v495_v37 = vmul.f32 %v493_v29, %v489_v35  ;;  %2261 = vmatprep.mubr.msk.f32.mxu0 %vm462_vm0, %v500_v36  ;;  %v2085_v35 = vld [vmem:[%s3183_s5 + $0xb0] sm:$0xff]  ;;  %v751_v36 = vld [vmem:[%s3183_s5 + $0x8] sm:$0xff] }
 0x152   : > { %v501_v38 = vadd.f32 %v499_v32, %v495_v37  ;;  %v753_v32 = vld [vmem:[%s3183_s5 + $0x18] sm:$0xff]  ;;  %v2084_v37 = vld [vmem:[%s3183_s5 + $0xa8] sm:$0xff] }
 0x153   : > { %2299 = vmatprep.subr.mxu0 %v753_v32 }
 0x154   : > { %2262 = vmatmul.mubr.msk.f32.vlgmr.msra.gmra.mxu0 %vm462_vm0, %v501_v38  ;;  %v750_v38 = vld [vmem:[%s3183_s5] sm:$0xff] }
 0x155   : > { %2300 = vmatpush3.msra.mxu0 %v753_v32  ;;  %v2123_v32 = vld [vmem:[%s3183_s5 + $0x60] sm:$0xff] }
 0x156   : > { %2301 = vmatprep.subr.mxu0 %v752_v34 }
 0x157   : > { %2302 = vmatpush3.msra.mxu0 %v752_v34  ;;  %v2141_v34 = vld [vmem:[%s3183_s5 + $0x170] sm:$0xff] }
 0x158   : > { %2303 = vmatprep.subr.mxu0 %v751_v36 }
 0x159   : > { %2304 = vmatpush3.msra.mxu0 %v751_v36  ;;  %v2139_v36 = vld [vmem:[%s3183_s5 + $0x160] sm:$0xff] }
 0x15a   : > { %2305 = vmatprep.subr.mxu0 %v750_v38 }
 0x15b   : > { %2306 = vmatpush3.msra.mxu0 %v750_v38 }
 0x15c   : > { %2310 = vmatprep.subr.mxu0 %v2066_v40 }
 0x214   : > { %v2263_v56 = vpop.f32.mrf.mxu0 }
 0x215   : > { %v591_v57 = vadd.f32 %v2263_v56, %v2056_v55 }
 0x216   : > { %v585_v58 = vpop.f32.mrf.mxu0 }
 0x217   : > { %v2060_v59 = vmul.f32 -1.442695, %v591_v57  ;;  %v586_v60 = vadd.f32 %v2056_v55, %v585_v58  ;;  %v744_v55 = vrot.slane %v2735_v27, %v743_v51  ;;  %v2101_v27 = vld [vmem:[%s3183_s5 + $0x50] sm:$0xff] }
 0x219   : > { %2492 = vpow2.f32 %v2060_v59  ;;  %v2059_v61 = vmul.f32 -1.442695, %v586_v60 }
 0x21b   : > { %2494 = vpow2.f32 %v2059_v61  ;;  %v2100_v61 = vld [vmem:[%s3183_s5 + $0x48] sm:$0xff] }
 0x226   : > { %v2493_v62 = vpop.eup %2492 }
 0x227   : > { %v601_v63 = vadd.f32 1.0, %v2493_v62  ;;  %v2063_v62 = vld [vmem:[%s3183_s5 + $0x80] sm:$0xff] }
 0x228   : > { %v2495_v2 = vpop.eup %2494 }
 0x229   : > { %v600_v3 = vadd.f32 1.0, %v2495_v2  ;;  %2496 = vrcp.f32 %v601_v63  ;;  %v2099_v63 = vld [vmem:[%s3183_s5 + $0x40] sm:$0xff]  ;;  %v2072_v2 = vld [vmem:[%s3183_s5 + $0x118] sm:$0xff] }
 0x22b   : > { %2498 = vrcp.f32 %v600_v3  ;;  %v2118_v3 = vld [vmem:[%s3183_s5 + $0x158] sm:$0xff] }
 0x236   : > { %v2497_v4 = vpop.eup %2496 }
 0x237   : > { %v607_v7 = vmul.f32 %v2497_v4, %v591_v57  ;;  %v2071_v4 = vld [vmem:[%s3183_s5 + $0x110] sm:$0xff] }
 0x238   : > { %v2499_v5 = vpop.eup %2498 }
 0x239   : > { %v606_v6 = vmul.f32 %v2499_v5, %v586_v60  ;;  %v2064_v60 = vld [vmem:[%s3183_s5 + $0x88] sm:$0xff]  ;;  %v2117_v5 = vld [vmem:[%s3183_s5 + $0x150] sm:$0xff] }
 0x23b   : > { %2296 = vmatprep.mubr.f32.mxu1 %v606_v6  ;;  %v2070_v6 = vld [vmem:[%s3183_s5 + $0x108] sm:$0xff] }
 0x23c   : > { %2297 = vmatmul.mubr.f32.vlgmr.msra.gmra.mxu1 %v607_v7  ;;  %v2116_v7 = vld [vmem:[%s3183_s5 + $0x148] sm:$0xff] }
 0x23d   : > { %2344 = vmatpush3.msra.mxu1 %v2086_v33  ;;  %v2142_v33 = vld [vmem:[%s3183_s5 + $0x178] sm:$0xff] }
 0x23e   : > { %2345 = vmatprep.subr.mxu1 %v2085_v35 }
 0x23f   : > { %2346 = vmatpush3.msra.mxu1 %v2085_v35  ;;  %v2140_v35 = vld [vmem:[%s3183_s5 + $0x168] sm:$0xff] }
 0x240   : > { %2347 = vmatprep.subr.mxu1 %v2084_v37 }
 0x241   : > { %2348 = vmatpush3.msra.mxu1 %v2084_v37 }
 0x242   : > { %2349 = vmatprep.subr.mxu1 %v2083_v39 }
 0x243   : > { %2350 = vmatpush3.msra.mxu1 %v2083_v39 }
 0x244   : > { %2365 = vmatprep.subr.mxu1 %v2102_v41 }
 0x2fc   : > { %v2298_v10 = vpop.f32.mrf.mxu1 }
 0x2fd   : > { %v700_v11 = vadd.f32 %v2298_v10, %v627_v9  ;;  %v2115_v10 = vld [vmem:[%s3183_s5 + $0x140] sm:$0xff] }
 0x2fe   : > { %v694_v12 = vpop.f32.mrf.mxu1 }
 0x2ff   : > { %v704_v13 = vmul.f32 0.5, %v700_v11  ;;  %v695_v14 = vadd.f32 %v694_v12, %v627_v9  ;;  %v2069_v9 = vld [vmem:[%s3183_s5 + $0x100] sm:$0xff]  ;;  %v2078_v11 = vld [vmem:[%s3183_s5 + $0x38] sm:$0xff] }
 0x300   : > { %v2134_v12 = vld [vmem:[%s3183_s5 + $0xf8] sm:$0xff] }
 0x301   : > { %v706_v15 = vadd.f32 %v704_v13, %v2705_v1  ;;  %v703_v16 = vmul.f32 0.5, %v695_v14  ;;  %v2077_v13 = vld [vmem:[%s3183_s5 + $0x30] sm:$0xff] }
 0x302   : > { %v2133_v14 = vld [vmem:[%s3183_s5 + $0xf0] sm:$0xff] }
 0x303   : > { %708 = vst.msk [vmem:[%s2806_s19 + $0x8] sm:$0xff] %vm462_vm0, %v706_v15  ;;  %v705_v17 = vadd.f32 %v703_v16, %v2703_v0  ;;  %v712_v18 = vsel %vm462_vm0, %v706_v15, 0.0  ;;  %v2132_v16 = vld [vmem:[%s3183_s5 + $0xe8] sm:$0xff] }
 0x304   : > { %713 = vadd.xlane.f32.xlu1 %v712_v18  ;;  %v2131_v18 = vld [vmem:[%s3183_s5 + $0xe0] sm:$0xff] }
 0x305   : > { %707 = vst.msk [vmem:[%s2806_s19] sm:$0xff] %vm462_vm0, %v705_v17  ;;  %v709_v19 = vsel %vm462_vm0, %v705_v17, 0.0  ;;  %s2508_s19 = sshll.u32 %s2582_s16, 4  ;;  %s2509_s19 = int_to_ptr.vmem [resolvable:$false] %s2508_s19 }
 0x306   : > { %710 = vadd.xlane.f32.xlu0 %v709_v19  ;;  %v2094_v19 = vld [vmem:[%s3183_s5 + $0x138] sm:$0xff]  ;;  %s2510_s0 = scalar_lea.vmem %s2509_s19, 512  ;;  %p2511_p1 = scmp.lt.s32.totalorder %s3027_s22, %s2509_s19 }
 0x307   : > { %p2512_p2 = scmp.lt.s32.totalorder %s2510_s0, %s2504_s12 }
 0x309   : > { %p2513_p3 = por %p2512_p2, %p2511_p1 }
 0x30b   : > { %p2514_p5 = pnand %p2513_p3, %p2507_p0 }
 0x38d   : > { %v714_v20 = vpop.xlane.xlu1 %713 }
 0x38e   : > { %v716_v21 = vmul.f32 0.03125, %v714_v20  ;;  %v2093_v20 = vld [vmem:[%s3183_s5 + $0x130] sm:$0xff] }
 0x38f   : > { %v711_v1 = vpop.xlane.xlu0 %710 }
 0x390   : > { %v718_v22 = vsub.f32 %v706_v15, %v716_v21  ;;  %v715_v23 = vmul.f32 0.03125, %v711_v1  ;;  %v2076_v15 = vld [vmem:[%s3183_s5 + $0x28] sm:$0xff]  ;;  %v2091_v1 = vld [vmem:[%s3183_s5 + $0x120] sm:$0xff] }
 0x391   : > { %v2092_v21 = vld [vmem:[%s3183_s5 + $0x128] sm:$0xff] }
 0x392   : > { %v717_v24 = vsub.f32 %v705_v17, %v715_v23  ;;  %v720_v29 = vmul.f32 %v718_v22, %v718_v22  ;;  %v2075_v17 = vld [vmem:[%s3183_s5 + $0x20] sm:$0xff]  ;;  %v2109_v23 = vld [vmem:[%s3183_s5 + $0xd0] sm:$0xff] }
 0x394   : > { %v724_v30 = vsel %vm462_vm0, %v720_v29, 0.0  ;;  %v719_v31 = vmul.f32 %v717_v24, %v717_v24  ;;  %v2107_v29 = vld [vmem:[%s3183_s5 + $0xc0] sm:$0xff] }
 0x395   : > { %725 = vadd.xlane.f32.xlu1 %v724_v30  ;;  %v2126_v30 = vld [vmem:[%s3183_s5 + $0x78] sm:$0xff] }
 0x396   : > { %v721_v0 = vsel %vm462_vm0, %v719_v31, 0.0  ;;  %v2125_v31 = vld [vmem:[%s3183_s5 + $0x70] sm:$0xff] }
 0x397   : > { %722 = vadd.xlane.f32.xlu0 %v721_v0  ;;  %v2124_v0 = vld [vmem:[%s3183_s5 + $0x68] sm:$0xff] }
 0x41e   : > { %v726_v42 = vpop.xlane.xlu1 %725 }
 0x41f   : > { %v728_v43 = vmul.f32 0.03125, %v726_v42 }
 0x420   : > { %v723_v44 = vpop.xlane.xlu0 %722 }
 0x421   : > { %v730_v45 = vadd.f32 1e-05, %v728_v43  ;;  %v727_v46 = vmul.f32 0.03125, %v723_v44 }
 0x423   : > { %2500 = vrsqrt.f32 %v730_v45  ;;  %v729_v47 = vadd.f32 1e-05, %v727_v46 }
 0x425   : > { %2502 = vrsqrt.f32 %v729_v47 }
 0x430   : > { %v2501_v49 = vpop.eup %2500 }
 0x431   : > { %v734_v52 = vmul.f32 %v2501_v49, %v718_v22  ;;  %v2110_v22 = vld [vmem:[%s3183_s5 + $0xd8] sm:$0xff] }
 0x432   : > { %v2503_v53 = vpop.eup %2502 }
 0x433   : > { %v733_v54 = vmul.f32 %v2503_v53, %v717_v24  ;;  %v740_v56 = vmul.f32 %v738_v50, %v734_v52  ;;  %v2108_v24 = vld [vmem:[%s3183_s5 + $0xc8] sm:$0xff] }
 0x435   : > { %v739_v57 = vmul.f32 %v738_v50, %v733_v54  ;;  %v2856_v59 = vadd.f32 %v744_v55, %v740_v56 }
 0x437   : > { %v2854_v58 = vadd.f32 %v744_v55, %v739_v57 }
 0x439   : > { %2307 = vmatprep.mubr.msk.f32.mxu0 %vm462_vm0, %v2854_v58  ;;  %2351 = vmatprep.mubr.msk.f32.mxu1 %vm462_vm0, %v2854_v58 }
 0x43a   : > { %2308 = vmatmul.mubr.msk.f32.vlgmr.msra.gmra.mxu0 %vm462_vm0, %v2856_v59  ;;  %2352 = vmatmul.mubr.msk.f32.vlgmr.msra.gmra.mxu1 %vm462_vm0, %v2856_v59 }
 0x43b   : > { %2311 = vmatpush3.msra.mxu0 %v2066_v40  ;;  %2366 = vmatpush3.msra.mxu1 %v2102_v41 }
 0x43c   : > { %2312 = vmatprep.subr.mxu0 %v2065_v25  ;;  %2318 = vmatprep.mubr.msk.f32.mxu0 %vm462_vm0, %v2854_v58 }
 0x43d   : > { %2367 = vmatprep.subr.mxu1 %v2101_v27  ;;  %2373 = vmatprep.mubr.msk.f32.mxu1 %vm462_vm0, %v2854_v58 }
 0x43e   : > { %2313 = vmatpush3.msra.mxu0 %v2065_v25  ;;  %2368 = vmatpush3.msra.mxu1 %v2101_v27 }
 0x43f   : > { %2314 = vmatprep.subr.mxu0 %v2064_v60  ;;  %2369 = vmatprep.subr.mxu1 %v2100_v61 }
 0x440   : > { %2315 = vmatpush3.msra.mxu0 %v2064_v60  ;;  %2370 = vmatpush3.msra.mxu1 %v2100_v61 }
 0x441   : > { %2316 = vmatprep.subr.mxu0 %v2063_v62  ;;  %2371 = vmatprep.subr.mxu1 %v2099_v63 }
 0x442   : > { %2317 = vmatpush3.msra.mxu0 %v2063_v62  ;;  %2372 = vmatpush3.msra.mxu1 %v2099_v63 }
 0x443   : > { %2319 = vmatmul.mubr.msk.f32.vlgmr.msra.gmra.mxu0 %vm462_vm0, %v2856_v59  ;;  %2321 = vmatprep.subr.mxu0 %v2072_v2 }
 0x444   : > { %2374 = vmatmul.mubr.msk.f32.vlgmr.msra.gmra.mxu1 %vm462_vm0, %v2856_v59  ;;  %2387 = vmatprep.subr.mxu1 %v2118_v3 }
 0x445   : > { %2322 = vmatpush3.msra.mxu0 %v2072_v2  ;;  %2329 = vmatprep.mubr.msk.f32.mxu0 %vm462_vm0, %v2854_v58 }
 0x446   : > { %2388 = vmatpush3.msra.mxu1 %v2118_v3  ;;  %2395 = vmatprep.mubr.msk.f32.mxu1 %vm462_vm0, %v2854_v58 }
 0x447   : > { %2323 = vmatprep.subr.mxu0 %v2071_v4  ;;  %2389 = vmatprep.subr.mxu1 %v2117_v5 }
 0x448   : > { %2324 = vmatpush3.msra.mxu0 %v2071_v4  ;;  %2390 = vmatpush3.msra.mxu1 %v2117_v5 }
 0x449   : > { %2325 = vmatprep.subr.mxu0 %v2070_v6  ;;  %2391 = vmatprep.subr.mxu1 %v2116_v7 }
 0x44a   : > { %2326 = vmatpush3.msra.mxu0 %v2070_v6  ;;  %2392 = vmatpush3.msra.mxu1 %v2116_v7 }
 0x44b   : > { %2327 = vmatprep.subr.mxu0 %v2069_v9  ;;  %2393 = vmatprep.subr.mxu1 %v2115_v10 }
 0x44c   : > { %2328 = vmatpush3.msra.mxu0 %v2069_v9  ;;  %2394 = vmatpush3.msra.mxu1 %v2115_v10 }
 0x44d   : > { %2330 = vmatmul.mubr.msk.f32.vlgmr.msra.gmra.mxu0 %vm462_vm0, %v2856_v59  ;;  %2332 = vmatprep.subr.mxu0 %v2078_v11 }
 0x44e   : > { %2396 = vmatmul.mubr.msk.f32.vlgmr.msra.gmra.mxu1 %vm462_vm0, %v2856_v59  ;;  %2409 = vmatprep.subr.mxu1 %v2134_v12 }
 0x44f   : > { %2333 = vmatpush3.msra.mxu0 %v2078_v11  ;;  %2340 = vmatprep.mubr.msk.f32.mxu0 %vm462_vm0, %v2854_v58 }
 0x450   : > { %2410 = vmatpush3.msra.mxu1 %v2134_v12  ;;  %2417 = vmatprep.mubr.msk.f32.mxu1 %vm462_vm0, %v2854_v58 }
 0x451   : > { %2334 = vmatprep.subr.mxu0 %v2077_v13  ;;  %2411 = vmatprep.subr.mxu1 %v2133_v14 }
 0x452   : > { %2335 = vmatpush3.msra.mxu0 %v2077_v13  ;;  %2412 = vmatpush3.msra.mxu1 %v2133_v14 }
 0x453   : > { %2336 = vmatprep.subr.mxu0 %v2076_v15  ;;  %2413 = vmatprep.subr.mxu1 %v2132_v16 }
 0x454   : > { %2337 = vmatpush3.msra.mxu0 %v2076_v15  ;;  %2414 = vmatpush3.msra.mxu1 %v2132_v16 }
 0x455   : > { %2338 = vmatprep.subr.mxu0 %v2075_v17  ;;  %2415 = vmatprep.subr.mxu1 %v2131_v18 }
 0x456   : > { %2339 = vmatpush3.msra.mxu0 %v2075_v17  ;;  %2416 = vmatpush3.msra.mxu1 %v2131_v18 }
 0x457   : > { %2341 = vmatmul.mubr.msk.f32.vlgmr.msra.gmra.mxu0 %vm462_vm0, %v2856_v59  ;;  %2354 = vmatprep.subr.mxu0 %v2094_v19 }
 0x458   : > { %2418 = vmatmul.mubr.msk.f32.vlgmr.msra.gmra.mxu1 %vm462_vm0, %v2856_v59  ;;  %2355 = vmatpush3.msra.mxu0 %v2094_v19 }
 0x459   : > { %2362 = vmatprep.mubr.msk.f32.mxu0 %vm462_vm0, %v2854_v58  ;;  %2356 = vmatprep.subr.mxu0 %v2093_v20 }
 0x45a   : > { %2357 = vmatpush3.msra.mxu0 %v2093_v20 }
 0x45b   : > { %2358 = vmatprep.subr.mxu0 %v2092_v21 }
 0x45c   : > { %2359 = vmatpush3.msra.mxu0 %v2092_v21 }
 0x45d   : > { %2360 = vmatprep.subr.mxu0 %v2091_v1 }
 0x45e   : > { %2361 = vmatpush3.msra.mxu0 %v2091_v1 }
 0x45f   : > { %2363 = vmatmul.mubr.msk.f32.vlgmr.msra.gmra.mxu0 %vm462_vm0, %v2856_v59  ;;  %2376 = vmatprep.subr.mxu0 %v2110_v22 }
 0x460   : > { %2377 = vmatpush3.msra.mxu0 %v2110_v22  ;;  %2384 = vmatprep.mubr.msk.f32.mxu0 %vm462_vm0, %v2854_v58 }
 0x461   : > { %2378 = vmatprep.subr.mxu0 %v2109_v23 }
 0x462   : > { %2379 = vmatpush3.msra.mxu0 %v2109_v23 }
 0x463   : > { %2380 = vmatprep.subr.mxu0 %v2108_v24 }
 0x464   : > { %2381 = vmatpush3.msra.mxu0 %v2108_v24 }
 0x465   : > { %2382 = vmatprep.subr.mxu0 %v2107_v29 }
 0x466   : > { %2383 = vmatpush3.msra.mxu0 %v2107_v29 }
 0x467   : > { %2385 = vmatmul.mubr.msk.f32.vlgmr.msra.gmra.mxu0 %vm462_vm0, %v2856_v59  ;;  %2398 = vmatprep.subr.mxu0 %v2126_v30 }
 0x468   : > { %2399 = vmatpush3.msra.mxu0 %v2126_v30  ;;  %2406 = vmatprep.mubr.msk.f32.mxu0 %vm462_vm0, %v2854_v58 }
 0x469   : > { %2400 = vmatprep.subr.mxu0 %v2125_v31 }
 0x46a   : > { %2401 = vmatpush3.msra.mxu0 %v2125_v31 }
 0x46b   : > { %2402 = vmatprep.subr.mxu0 %v2124_v0 }
 0x46c   : > { %2403 = vmatpush3.msra.mxu0 %v2124_v0 }
 0x46d   : > { %2404 = vmatprep.subr.mxu0 %v2123_v32 }
 0x46e   : > { %2405 = vmatpush3.msra.mxu0 %v2123_v32 }
 0x46f   : > { %2407 = vmatmul.mubr.msk.f32.vlgmr.msra.gmra.mxu0 %vm462_vm0, %v2856_v59  ;;  %2420 = vmatprep.subr.mxu0 %v2142_v33 }
 0x470   : > { %2421 = vmatpush3.msra.mxu0 %v2142_v33  ;;  %2428 = vmatprep.mubr.msk.f32.mxu0 %vm462_vm0, %v2854_v58 }
 0x471   : > { %2422 = vmatprep.subr.mxu0 %v2141_v34 }
 0x472   : > { %2423 = vmatpush3.msra.mxu0 %v2141_v34 }
 0x473   : > { %2424 = vmatprep.subr.mxu0 %v2140_v35 }
 0x474   : > { %2425 = vmatpush3.msra.mxu0 %v2140_v35 }
 0x475   : > { %2426 = vmatprep.subr.mxu0 %v2139_v36 }
 0x476   : > { %2427 = vmatpush3.msra.mxu0 %v2139_v36 }
 0x477   : > { %2429 = vmatmul.mubr.msk.f32.vlgmr.msra.gmra.mxu0 %vm462_vm0, %v2856_v59 }
 0x478   : > { %2517 = shalt.err (!%p2514_p5)
}
 0x479   : > { %s2518_s20 = scalar_lea.hbm %s3025_s29, 256  ;;  %s2522_s30 = scalar_lea.hbm %s3185_s7, 512 }
 0x47a   : > { %p2519_p6 = scmp.ne.s32.totalorder %s3025_s29, %s2518_s20  ;;  %p2523_p10 = scmp.lt.s32.totalorder %s3025_s29, %s3185_s7 }
 0x47b   : > { %p2524_p11 = scmp.lt.s32.totalorder %s2522_s30, %s2518_s20 }
 0x47c   : > { %p2520_p7 = pnand %p2519_p6, %p2680_p4 }
 0x47d   : > { %p2525_p12 = por %p2524_p11, %p2523_p10 }
 0x47e   : > { %p2521_p9 = pneg %p2520_p7 }
 0x480   : > { %p2526_p13 = pnand %p2525_p12, %p2521_p9 }
 0x482   : > { %2529 = shalt.err (!%p2526_p13)
}
 0x483   : > { %s2583_s0 = smov 128   ;;  %s2584_s12 = smov 8   ;;  %v3057_v37 = vld [vmem:[%s3184_s6] sm:$0xf]  ;;  %v3062_v38 = vld [vmem:[%s3184_s6 + $0x4] sm:$0xf] }
 0x484   : > { %2431 = dma.vmem_to_hbm [thread:$0]  (%p2680_p4), %s3027_s22, 256, %s3025_s29, %s3031_s11, %s2583_s0, %s2583_s0, %s2584_s12   ;;  %v757_v39 = vrot.slane %v3057_v37, %v2730_v26  ;;  %v1109_v40 = vrot.slane %v3062_v38, %v2738_v28  ;;  %vm839_vm1 = vcmask 64512   ;;  %v850_v50 = vrot.slane %v3062_v38, %v2730_v26 }
 0x485   : > { %s3065_s20 = sshll.u32 %s2697_s27, 6  ;;  %v1283_v51 = vrot.slane %v3057_v37, %v2798_v8  ;;  %v749_v25 = vld [vmem:[%s3184_s6 + $0x8] sm:$0xf]  ;;  %v1022_v6 = vrot.slane %v3057_v37, %v2738_v28  ;;  %v1631_v7 = vrot.slane %v3062_v38, %v2848_v48  ;;  %v1370_v1 = vrot.slane %v3062_v38, %v2798_v8 }
 0x486   : > { %s3075_s29 = scalar_lea.vmem %s3186_s8, %s3065_s20  ;;  %s3081_s27 = scalar_lea.vmem %s3187_s9, %s3065_s20  ;;  %v936_v27 = vrot.slane %v749_v25, %v2730_v26  ;;  %v1457_v60 = vrot.slane %v749_v25, %v2798_v8  ;;  %v1196_v17 = vrot.slane %v749_v25, %v2738_v28  ;;  %v1544_v29 = vrot.slane %v3057_v37, %v2848_v48 }
 0x487   : > { %s3112_s24 = scalar_lea.vmem %s3188_s10, %s3065_s20  ;;  %v1718_v8 = vrot.slane %v749_v25, %v2848_v48 }
 0x4fa   : > { %v2309_v41 = vpop.f32.mrf.mxu0  ;;  %v2353_v42 = vpop.f32.mrf.mxu1 }
 0x4fb   : > { %v836_v43 = vadd.f32 %v2309_v41, %v757_v39  ;;  %v1182_v44 = vadd.f32 %v2353_v42, %v1109_v40 }
 0x4fc   : > { %v830_v45 = vpop.f32.mrf.mxu0  ;;  %v1176_v46 = vpop.f32.mrf.mxu1 }
 0x4fd   : > { %841 = vst.msk [vmem:[%s3075_s29 + $0x8] sm:$0xff] %vm839_vm1, %v836_v43  ;;  %2090 = vst.msk [vmem:[%s3081_s27 + $0x18] sm:$0xff] %vm839_vm1, %v1182_v44  ;;  %v831_v47 = vadd.f32 %v830_v45, %v757_v39  ;;  %v1177_v49 = vadd.f32 %v1176_v46, %v1109_v40 }
 0x4ff   : > { %840 = vst.msk [vmem:[%s3075_s29] sm:$0xff] %vm839_vm1, %v831_v47  ;;  %2089 = vst.msk [vmem:[%s3081_s27 + $0x10] sm:$0xff] %vm839_vm1, %v1177_v49 }
 0x503   : > { %v2320_v52 = vpop.f32.mrf.mxu0 }
 0x504   : > { %v923_v53 = vadd.f32 %v2320_v52, %v850_v50  ;;  %v2375_v54 = vpop.f32.mrf.mxu1 }
 0x505   : > { %v1356_v55 = vadd.f32 %v2375_v54, %v1283_v51  ;;  %v917_v56 = vpop.f32.mrf.mxu0 }
 0x506   : > { %927 = vst.msk [vmem:[%s3081_s27 + $0x8] sm:$0xff] %vm839_vm1, %v923_v53  ;;  %v918_v57 = vadd.f32 %v917_v56, %v850_v50  ;;  %v1350_v58 = vpop.f32.mrf.mxu1 }
 0x507   : > { %2106 = vst.msk [vmem:[%s3075_s29 + $0x28] sm:$0xff] %vm839_vm1, %v1356_v55  ;;  %v1351_v59 = vadd.f32 %v1350_v58, %v1283_v51 }
 0x508   : > { %926 = vst.msk [vmem:[%s3081_s27] sm:$0xff] %vm839_vm1, %v918_v57 }
 0x509   : > { %2105 = vst.msk [vmem:[%s3075_s29 + $0x20] sm:$0xff] %vm839_vm1, %v1351_v59 }
 0x50d   : > { %v2331_v61 = vpop.f32.mrf.mxu0 }
 0x50e   : > { %v1009_v62 = vadd.f32 %v2331_v61, %v936_v27  ;;  %v2397_v63 = vpop.f32.mrf.mxu1 }
 0x50f   : > { %v1530_v2 = vadd.f32 %v2397_v63, %v1457_v60  ;;  %v1003_v3 = vpop.f32.mrf.mxu0 }
 0x510   : > { %1013 = vst.msk [vmem:[%s3112_s24 + $0x8] sm:$0xff] %vm839_vm1, %v1009_v62  ;;  %v1004_v26 = vadd.f32 %v1003_v3, %v936_v27  ;;  %v1524_v4 = vpop.f32.mrf.mxu1 }
 0x511   : > { %2122 = vst.msk [vmem:[%s3112_s24 + $0x28] sm:$0xff] %vm839_vm1, %v1530_v2  ;;  %v1525_v5 = vadd.f32 %v1524_v4, %v1457_v60 }
 0x512   : > { %1012 = vst.msk [vmem:[%s3112_s24] sm:$0xff] %vm839_vm1, %v1004_v26 }
 0x513   : > { %2121 = vst.msk [vmem:[%s3112_s24 + $0x20] sm:$0xff] %vm839_vm1, %v1525_v5 }
 0x517   : > { %v2342_v9 = vpop.f32.mrf.mxu0 }
 0x518   : > { %v1095_v10 = vadd.f32 %v2342_v9, %v1022_v6  ;;  %v2419_v11 = vpop.f32.mrf.mxu1 }
 0x519   : > { %v1704_v12 = vadd.f32 %v2419_v11, %v1631_v7  ;;  %v1089_v13 = vpop.f32.mrf.mxu0 }
 0x51a   : > { %2082 = vst.msk [vmem:[%s3075_s29 + $0x18] sm:$0xff] %vm839_vm1, %v1095_v10  ;;  %v1090_v14 = vadd.f32 %v1089_v13, %v1022_v6  ;;  %v1698_v15 = vpop.f32.mrf.mxu1 }
 0x51b   : > { %2138 = vst.msk [vmem:[%s3081_s27 + $0x38] sm:$0xff] %vm839_vm1, %v1704_v12  ;;  %v1699_v16 = vadd.f32 %v1698_v15, %v1631_v7 }
 0x51c   : > { %2081 = vst.msk [vmem:[%s3075_s29 + $0x10] sm:$0xff] %vm839_vm1, %v1090_v14 }
 0x51d   : > { %2137 = vst.msk [vmem:[%s3081_s27 + $0x30] sm:$0xff] %vm839_vm1, %v1699_v16 }
 0x51f   : > { %v2364_v18 = vpop.f32.mrf.mxu0 }
 0x520   : > { %v1269_v19 = vadd.f32 %v2364_v18, %v1196_v17 }
 0x521   : > { %v1263_v20 = vpop.f32.mrf.mxu0 }
 0x522   : > { %2098 = vst.msk [vmem:[%s3112_s24 + $0x18] sm:$0xff] %vm839_vm1, %v1269_v19  ;;  %v1264_v21 = vadd.f32 %v1263_v20, %v1196_v17 }
 0x524   : > { %2097 = vst.msk [vmem:[%s3112_s24 + $0x10] sm:$0xff] %vm839_vm1, %v1264_v21 }
 0x527   : > { %v2386_v22 = vpop.f32.mrf.mxu0 }
 0x528   : > { %v1443_v23 = vadd.f32 %v2386_v22, %v1370_v1 }
 0x529   : > { %v1437_v24 = vpop.f32.mrf.mxu0 }
 0x52a   : > { %2114 = vst.msk [vmem:[%s3081_s27 + $0x28] sm:$0xff] %vm839_vm1, %v1443_v23  ;;  %v1438_v28 = vadd.f32 %v1437_v24, %v1370_v1 }
 0x52c   : > { %2113 = vst.msk [vmem:[%s3081_s27 + $0x20] sm:$0xff] %vm839_vm1, %v1438_v28 }
 0x52f   : > { %v2408_v30 = vpop.f32.mrf.mxu0 }
 0x530   : > { %v1617_v31 = vadd.f32 %v2408_v30, %v1544_v29 }
 0x531   : > { %v1611_v0 = vpop.f32.mrf.mxu0 }
 0x532   : > { %2130 = vst.msk [vmem:[%s3075_s29 + $0x38] sm:$0xff] %vm839_vm1, %v1617_v31  ;;  %v1612_v32 = vadd.f32 %v1611_v0, %v1544_v29 }
 0x534   : > { %2129 = vst.msk [vmem:[%s3075_s29 + $0x30] sm:$0xff] %vm839_vm1, %v1612_v32 }
 0x537   : > { %v2430_v33 = vpop.f32.mrf.mxu0 }
 0x538   : > { %v1791_v34 = vadd.f32 %v2430_v33, %v1718_v8 }
 0x539   : > { %v1785_v35 = vpop.f32.mrf.mxu0 }
 0x53a   : > { %2146 = vst.msk [vmem:[%s3112_s24 + $0x38] sm:$0xff] %vm839_vm1, %v1791_v34  ;;  %v1786_v36 = vadd.f32 %v1785_v35, %v1718_v8 }
 0x53c   : > { %2145 = vst.msk [vmem:[%s3112_s24 + $0x30] sm:$0xff] %vm839_vm1, %v1786_v36 }
 0x53d PF: > { %p2437_p4 = scmp.ge.s32.totalorder %s2580_s18, 2  ;;  %s1867_s1 = sand.u32 1, %s2560_s13  }
 0x53e   : > { %s1868_s28 = scalar_lea.sflag [#allocation3], %s1867_s1 }
 0x53f   : > { %p2434_p0 = pnand %p2437_p4, %p2687_p8 }
 0x541   : > { %p2435_p1 = pneg %p2434_p0 }
 0x543   : > { %2555 = dma.done.wait (%p2435_p1), %s1868_s28, 256  }
 0x544   : > { %2557 = vsyncadd (%p2435_p1), %s1868_s28, 4294967040  ;;  %s24_s18 = sadd.s32 1, %s2580_s18   ;;  %s3197_s13 = smov %s2564_s14 }
 0x545   : > { %p21_p2 = scmp.ge.s32.totalorder %s24_s18, 4   ;;  %s3198_s14 = smov %s2568_s15 }
 0x546   : > { %s3199_s15 = smov %s2693_s26  ;;  %s3200_s16 = smov %s2576_s17 }
 0x547   : > { %s3201_s17 = smov %s3203_s21  ;;  %23 = sbr.rel (!%p21_p2) target bundleno = 7 (0x7), region = 139 }
 0x54c   :  { %1909 = vsyncpa [#allocation3], 1 }
 0x54d   :  { %1911 = vsyncpa [#allocation3 + $0x1], 1 }

</bundles_post_ra>
